<compile_context>
chip_gen: v5e
topology: v5e:2x2
jax: 0.10.0
libtpu: 0.0.40
codegen_flags: <defaults>
</compile_context>

<pallas_src>
import functools

import jax
import jax.numpy as jnp
from jax.experimental import pallas as pl
from jax.experimental.pallas import tpu as pltpu

LN_EPS = 1e-5  # PyTorch nn.LayerNorm default eps


def _make_fused_mlp_kernel(num_hidden):
    """Build a fused kernel: num_hidden x (Linear -> LayerNorm -> ReLU) -> Linear."""

    def kernel(x_ref, *refs):
        # refs = [w1, b1, g1, beta1, ..., wH, bH, gH, betaH, w_out, b_out, o_ref]
        o_ref = refs[-1]
        prefs = refs[:-1]
        h = x_ref[...]                       # (TB, in_dim), f32
        idx = 0
        for _ in range(num_hidden):
            w = prefs[idx][...]              # (K, N), bf16
            b = prefs[idx + 1][...]          # (1, N), f32
            g = prefs[idx + 2][...]          # (1, N), f32
            beta = prefs[idx + 3][...]       # (1, N), f32
            idx += 4
            # MXU matmul in the weights' dtype, f32 accumulation.
            z = jnp.dot(h.astype(w.dtype), w,
                        preferred_element_type=jnp.float32) + b
            # LayerNorm in f32 (biased variance, eps inside rsqrt == torch LN).
            mean = jnp.mean(z, axis=-1, keepdims=True)
            var = jnp.mean((z - mean) ** 2, axis=-1, keepdims=True)
            zn = (z - mean) * jax.lax.rsqrt(var + LN_EPS)
            h = jnp.maximum(zn * g + beta, 0.0)   # f32 activation stays in vregs
        w = prefs[idx][...]
        b = prefs[idx + 1][...]
        out = jnp.dot(h.astype(w.dtype), w,
                      preferred_element_type=jnp.float32) + b
        o_ref[...] = out.astype(o_ref.dtype)

    return kernel


def init_mlp_params(key, input_dim, hidden_dims, output_dim):
    """Deterministic parameter init (shapes match nn.Linear / nn.LayerNorm).

    Returns a pure-array pytree:
      {"hidden": ((w, b, gamma, beta), ...), "out": (w, b)}  -- all f32.
    """
    hidden = []
    prev = input_dim
    for dim in hidden_dims:
        key, kw, kb = jax.random.split(key, 3)
        bound = 1.0 / (prev ** 0.5)
        w = jax.random.uniform(kw, (prev, dim), jnp.float32, -bound, bound)
        b = jax.random.uniform(kb, (dim,), jnp.float32, -bound, bound)
        gamma = jnp.ones((dim,), jnp.float32)
        beta = jnp.zeros((dim,), jnp.float32)
        hidden.append((w, b, gamma, beta))
        prev = dim
    key, kw, kb = jax.random.split(key, 3)
    bound = 1.0 / (prev ** 0.5)
    w_out = jax.random.uniform(kw, (prev, output_dim), jnp.float32, -bound, bound)
    b_out = jax.random.uniform(kb, (output_dim,), jnp.float32, -bound, bound)
    return {"hidden": tuple(hidden), "out": (w_out, b_out)}


def prepare_params(params, use_bf16=True):
    """One-time prep outside jit: cast weights to the matmul dtype and reshape
    bias / LN vectors to (1, N) so the jitted forward has zero wrapper ops."""
    dt = jnp.bfloat16 if use_bf16 else jnp.float32
    hidden = tuple(
        (w.astype(dt), b.reshape(1, -1), g.reshape(1, -1), beta.reshape(1, -1))
        for (w, b, g, beta) in params["hidden"]
    )
    w_out, b_out = params["out"]
    return {"hidden": hidden, "out": (w_out.astype(dt), b_out.reshape(1, -1))}


@functools.partial(jax.jit, static_argnames=("batch_tile",))
def mlp_forward(x, prepared, batch_tile=128):
    hidden = prepared["hidden"]
    w_out, b_out = prepared["out"]
    B, in_dim = x.shape
    out_dim = w_out.shape[1]
    num_hidden = len(hidden)

    # Batch tiling: multiple of 8 and divides B (else fall back to whole batch).
    tb = min(batch_tile, B)
    if B % tb != 0 or (tb != B and tb % 8 != 0):
        tb = B
    grid = (B // tb,)

    # --- assemble kernel operands + BlockSpecs ---
    args = [x]
    in_specs = [pl.BlockSpec((tb, in_dim), lambda i: (i, 0))]

    def add_full(arr):
        # Constant index_map => block never changes => stays resident in VMEM.
        args.append(arr)
        in_specs.append(pl.BlockSpec(arr.shape, lambda i: (0, 0)))

    for (w, b, g, beta) in hidden:
        add_full(w)        # bf16 weights
        add_full(b)        # f32 (1, N)
        add_full(g)
        add_full(beta)
    add_full(w_out)
    add_full(b_out)

    out_spec = pl.BlockSpec((tb, out_dim), lambda i: (i, 0))

    # --- cost estimate (helps XLA schedule this launch-bound custom call) ---
    dims = [in_dim] + [w.shape[1] for (w, _, _, _) in hidden] + [out_dim]
    flops = 2 * B * sum(dims[k] * dims[k + 1] for k in range(len(dims) - 1))
    transcendentals = B * num_hidden  # one rsqrt per row per LayerNorm
    bytes_accessed = sum(int(a.size) * a.dtype.itemsize for a in args)
    bytes_accessed += B * out_dim * 4
    cost = pl.CostEstimate(flops=flops, transcendentals=transcendentals,
                           bytes_accessed=bytes_accessed)

    return pl.pallas_call(
        _make_fused_mlp_kernel(num_hidden),
        out_shape=jax.ShapeDtypeStruct((B, out_dim), jnp.float32),
        grid_spec=pl.GridSpec(grid=grid, in_specs=in_specs, out_specs=out_spec),
        compiler_params=pltpu.CompilerParams(dimension_semantics=("parallel",)),
        cost_estimate=cost,
    )(*args)


def mlp_reference(x, params, use_bf16=True):
    """Pure-JAX reference mirroring the kernel's dtype handling."""
    cd = jnp.bfloat16 if use_bf16 else jnp.float32
    h = x
    for (w, b, g, beta) in params["hidden"]:
        z = jnp.dot(h.astype(cd), w.astype(cd),
                    preferred_element_type=jnp.float32) + b
        mean = jnp.mean(z, axis=-1, keepdims=True)
        var = jnp.mean((z - mean) ** 2, axis=-1, keepdims=True)
        z = (z - mean) * jax.lax.rsqrt(var + LN_EPS)
        h = jnp.maximum(z * g + beta, 0.0)
    w, b = params["out"]
    return jnp.dot(h.astype(cd), w.astype(cd),
                   preferred_element_type=jnp.float32) + b


if __name__ == "__main__":
    key = jax.random.PRNGKey(0)
    k_x, k_p = jax.random.split(key)

    batch = 256            # grid = (2,) with tb=128 -> both v7x cores get a tile
    input_dim = 32
    hidden_dims = [64, 32]
    output_dim = 16

    x = jax.random.normal(k_x, (batch, input_dim), jnp.float32)
    params = init_mlp_params(k_p, input_dim, hidden_dims, output_dim)
    prepared = prepare_params(params, use_bf16=True)

    out = jax.block_until_ready(mlp_forward(x, prepared))
    assert out.shape == (batch, output_dim)

    # Tight check vs a reference that uses the same bf16-operand / f32-accum math.
    ref = mlp_reference(x, params, use_bf16=True)
    assert jnp.allclose(out, ref, atol=1e-3, rtol=1e-3), "mismatch vs bf16 reference"

    # Loose check vs pure-f32 PyTorch semantics (bf16 matmul rounding only).
    ref_f32 = mlp_reference(x, params, use_bf16=False)
    assert jnp.allclose(out, ref_f32, atol=5e-2, rtol=5e-2), "drift vs f32 reference"

    print("KERNEL_OK")
</pallas_src>

<mosaic_0001>
module attributes {stable_mosaic.version = 11 : i64} {
  func.func @kernel(%arg0: i32, %arg1: memref<128x32xf32, #tpu.memory_space<vmem>>, %arg2: memref<32x64xbf16, #tpu.memory_space<vmem>>, %arg3: memref<1x64xf32, #tpu.memory_space<vmem>>, %arg4: memref<1x64xf32, #tpu.memory_space<vmem>>, %arg5: memref<1x64xf32, #tpu.memory_space<vmem>>, %arg6: memref<64x32xbf16, #tpu.memory_space<vmem>>, %arg7: memref<1x32xf32, #tpu.memory_space<vmem>>, %arg8: memref<1x32xf32, #tpu.memory_space<vmem>>, %arg9: memref<1x32xf32, #tpu.memory_space<vmem>>, %arg10: memref<32x16xbf16, #tpu.memory_space<vmem>>, %arg11: memref<1x16xf32, #tpu.memory_space<vmem>>, %arg12: memref<128x16xf32, #tpu.memory_space<vmem>>) attributes {dimension_semantics = [#tpu.dimension_semantics<parallel>], iteration_bounds = array<i64: 2>, scalar_prefetch = 0 : i64, scratch_operands = 0 : i64, tpu.core_type = #tpu.core_type<tc>, window_params = [{transform_indices = @transform_0, window_bounds = array<i64: 128, 32>}, {pipeline_mode = #tpu.pipeline_mode<synchronous>, transform_indices = @transform_1, window_bounds = array<i64: 32, 64>}, {pipeline_mode = #tpu.pipeline_mode<synchronous>, transform_indices = @transform_2, window_bounds = array<i64: 1, 64>}, {pipeline_mode = #tpu.pipeline_mode<synchronous>, transform_indices = @transform_3, window_bounds = array<i64: 1, 64>}, {pipeline_mode = #tpu.pipeline_mode<synchronous>, transform_indices = @transform_4, window_bounds = array<i64: 1, 64>}, {pipeline_mode = #tpu.pipeline_mode<synchronous>, transform_indices = @transform_5, window_bounds = array<i64: 64, 32>}, {pipeline_mode = #tpu.pipeline_mode<synchronous>, transform_indices = @transform_6, window_bounds = array<i64: 1, 32>}, {pipeline_mode = #tpu.pipeline_mode<synchronous>, transform_indices = @transform_7, window_bounds = array<i64: 1, 32>}, {pipeline_mode = #tpu.pipeline_mode<synchronous>, transform_indices = @transform_8, window_bounds = array<i64: 1, 32>}, {pipeline_mode = #tpu.pipeline_mode<synchronous>, transform_indices = @transform_9, window_bounds = array<i64: 32, 16>}, {pipeline_mode = #tpu.pipeline_mode<synchronous>, transform_indices = @transform_10, window_bounds = array<i64: 1, 16>}, {transform_indices = @transform_11, window_bounds = array<i64: 128, 16>}]} {
    %c0 = arith.constant 0 : index
    %c0_0 = arith.constant 0 : index
    %0 = vector.load %arg1[%c0, %c0_0] : memref<128x32xf32, #tpu.memory_space<vmem>>, vector<128x32xf32>
    %c0_1 = arith.constant 0 : index
    %c0_2 = arith.constant 0 : index
    %1 = vector.load %arg2[%c0_1, %c0_2] : memref<32x64xbf16, #tpu.memory_space<vmem>>, vector<32x64xbf16>
    %c0_3 = arith.constant 0 : index
    %c0_4 = arith.constant 0 : index
    %2 = vector.load %arg3[%c0_3, %c0_4] : memref<1x64xf32, #tpu.memory_space<vmem>>, vector<1x64xf32>
    %c0_5 = arith.constant 0 : index
    %c0_6 = arith.constant 0 : index
    %3 = vector.load %arg4[%c0_5, %c0_6] : memref<1x64xf32, #tpu.memory_space<vmem>>, vector<1x64xf32>
    %c0_7 = arith.constant 0 : index
    %c0_8 = arith.constant 0 : index
    %4 = vector.load %arg5[%c0_7, %c0_8] : memref<1x64xf32, #tpu.memory_space<vmem>>, vector<1x64xf32>
    %5 = arith.truncf %0 : vector<128x32xf32> to vector<128x32xbf16>
    %cst = arith.constant dense<0.000000e+00> : vector<128x64xf32>
    %6 = tpu.matmul %5, %1, %cst {dimension_numbers = #tpu.dot_dimension_numbers<[1], [0], [0], [1], [0, 0, 1, 1], [], []>} : vector<128x32xbf16>, vector<32x64xbf16>, vector<128x64xf32> -> vector<128x64xf32>
    %7 = vector.broadcast %2 : vector<1x64xf32> to vector<128x64xf32>
    %8 = arith.addf %6, %7 : vector<128x64xf32>
    %cst_9 = arith.constant dense<0.000000e+00> : vector<128xf32>
    %9 = vector.multi_reduction <add>, %8, %cst_9 [1] : vector<128x64xf32> to vector<128xf32>
    %10 = vector.shape_cast %9 : vector<128xf32> to vector<128x1xf32>
    %cst_10 = arith.constant 6.400000e+01 : f32
    %11 = vector.broadcast %cst_10 : f32 to vector<128x1xf32>
    %12 = arith.divf %10, %11 : vector<128x1xf32>
    %13 = vector.broadcast %12 : vector<128x1xf32> to vector<128x64xf32>
    %14 = arith.subf %8, %13 : vector<128x64xf32>
    %15 = arith.mulf %14, %14 : vector<128x64xf32>
    %cst_11 = arith.constant dense<0.000000e+00> : vector<128xf32>
    %16 = vector.multi_reduction <add>, %15, %cst_11 [1] : vector<128x64xf32> to vector<128xf32>
    %17 = vector.shape_cast %16 : vector<128xf32> to vector<128x1xf32>
    %cst_12 = arith.constant 6.400000e+01 : f32
    %18 = vector.broadcast %cst_12 : f32 to vector<128x1xf32>
    %19 = arith.divf %17, %18 : vector<128x1xf32>
    %20 = vector.broadcast %12 : vector<128x1xf32> to vector<128x64xf32>
    %21 = arith.subf %8, %20 : vector<128x64xf32>
    %cst_13 = arith.constant 9.99999974E-6 : f32
    %22 = vector.broadcast %cst_13 : f32 to vector<128x1xf32>
    %23 = arith.addf %19, %22 : vector<128x1xf32>
    %24 = math.rsqrt %23 : vector<128x1xf32>
    %25 = vector.broadcast %24 : vector<128x1xf32> to vector<128x64xf32>
    %26 = arith.mulf %21, %25 : vector<128x64xf32>
    %27 = vector.broadcast %3 : vector<1x64xf32> to vector<128x64xf32>
    %28 = arith.mulf %26, %27 : vector<128x64xf32>
    %29 = vector.broadcast %4 : vector<1x64xf32> to vector<128x64xf32>
    %30 = arith.addf %28, %29 : vector<128x64xf32>
    %cst_14 = arith.constant 0.000000e+00 : f32
    %31 = vector.broadcast %cst_14 : f32 to vector<128x64xf32>
    %32 = arith.maximumf %30, %31 : vector<128x64xf32>
    %c0_15 = arith.constant 0 : index
    %c0_16 = arith.constant 0 : index
    %33 = vector.load %arg6[%c0_15, %c0_16] : memref<64x32xbf16, #tpu.memory_space<vmem>>, vector<64x32xbf16>
    %c0_17 = arith.constant 0 : index
    %c0_18 = arith.constant 0 : index
    %34 = vector.load %arg7[%c0_17, %c0_18] : memref<1x32xf32, #tpu.memory_space<vmem>>, vector<1x32xf32>
    %c0_19 = arith.constant 0 : index
    %c0_20 = arith.constant 0 : index
    %35 = vector.load %arg8[%c0_19, %c0_20] : memref<1x32xf32, #tpu.memory_space<vmem>>, vector<1x32xf32>
    %c0_21 = arith.constant 0 : index
    %c0_22 = arith.constant 0 : index
    %36 = vector.load %arg9[%c0_21, %c0_22] : memref<1x32xf32, #tpu.memory_space<vmem>>, vector<1x32xf32>
    %37 = arith.truncf %32 : vector<128x64xf32> to vector<128x64xbf16>
    %cst_23 = arith.constant dense<0.000000e+00> : vector<128x32xf32>
    %38 = tpu.matmul %37, %33, %cst_23 {dimension_numbers = #tpu.dot_dimension_numbers<[1], [0], [0], [1], [0, 0, 1, 1], [], []>} : vector<128x64xbf16>, vector<64x32xbf16>, vector<128x32xf32> -> vector<128x32xf32>
    %39 = vector.broadcast %34 : vector<1x32xf32> to vector<128x32xf32>
    %40 = arith.addf %38, %39 : vector<128x32xf32>
    %cst_24 = arith.constant dense<0.000000e+00> : vector<128xf32>
    %41 = vector.multi_reduction <add>, %40, %cst_24 [1] : vector<128x32xf32> to vector<128xf32>
    %42 = vector.shape_cast %41 : vector<128xf32> to vector<128x1xf32>
    %cst_25 = arith.constant 3.200000e+01 : f32
    %43 = vector.broadcast %cst_25 : f32 to vector<128x1xf32>
    %44 = arith.divf %42, %43 : vector<128x1xf32>
    %45 = vector.broadcast %44 : vector<128x1xf32> to vector<128x32xf32>
    %46 = arith.subf %40, %45 : vector<128x32xf32>
    %47 = arith.mulf %46, %46 : vector<128x32xf32>
    %cst_26 = arith.constant dense<0.000000e+00> : vector<128xf32>
    %48 = vector.multi_reduction <add>, %47, %cst_26 [1] : vector<128x32xf32> to vector<128xf32>
    %49 = vector.shape_cast %48 : vector<128xf32> to vector<128x1xf32>
    %cst_27 = arith.constant 3.200000e+01 : f32
    %50 = vector.broadcast %cst_27 : f32 to vector<128x1xf32>
    %51 = arith.divf %49, %50 : vector<128x1xf32>
    %52 = vector.broadcast %44 : vector<128x1xf32> to vector<128x32xf32>
    %53 = arith.subf %40, %52 : vector<128x32xf32>
    %cst_28 = arith.constant 9.99999974E-6 : f32
    %54 = vector.broadcast %cst_28 : f32 to vector<128x1xf32>
    %55 = arith.addf %51, %54 : vector<128x1xf32>
    %56 = math.rsqrt %55 : vector<128x1xf32>
    %57 = vector.broadcast %56 : vector<128x1xf32> to vector<128x32xf32>
    %58 = arith.mulf %53, %57 : vector<128x32xf32>
    %59 = vector.broadcast %35 : vector<1x32xf32> to vector<128x32xf32>
    %60 = arith.mulf %58, %59 : vector<128x32xf32>
    %61 = vector.broadcast %36 : vector<1x32xf32> to vector<128x32xf32>
    %62 = arith.addf %60, %61 : vector<128x32xf32>
    %cst_29 = arith.constant 0.000000e+00 : f32
    %63 = vector.broadcast %cst_29 : f32 to vector<128x32xf32>
    %64 = arith.maximumf %62, %63 : vector<128x32xf32>
    %c0_30 = arith.constant 0 : index
    %c0_31 = arith.constant 0 : index
    %65 = vector.load %arg10[%c0_30, %c0_31] : memref<32x16xbf16, #tpu.memory_space<vmem>>, vector<32x16xbf16>
    %c0_32 = arith.constant 0 : index
    %c0_33 = arith.constant 0 : index
    %66 = vector.load %arg11[%c0_32, %c0_33] : memref<1x16xf32, #tpu.memory_space<vmem>>, vector<1x16xf32>
    %67 = arith.truncf %64 : vector<128x32xf32> to vector<128x32xbf16>
    %cst_34 = arith.constant dense<0.000000e+00> : vector<128x16xf32>
    %68 = tpu.matmul %67, %65, %cst_34 {dimension_numbers = #tpu.dot_dimension_numbers<[1], [0], [0], [1], [0, 0, 1, 1], [], []>} : vector<128x32xbf16>, vector<32x16xbf16>, vector<128x16xf32> -> vector<128x16xf32>
    %69 = vector.broadcast %66 : vector<1x16xf32> to vector<128x16xf32>
    %70 = arith.addf %68, %69 : vector<128x16xf32>
    %c0_35 = arith.constant 0 : index
    %c0_36 = arith.constant 0 : index
    %71 = vector.load %arg12[%c0_35, %c0_36] : memref<128x16xf32, #tpu.memory_space<vmem>>, vector<128x16xf32>
    tpu.vector_store %arg12[%c0_35, %c0_36], %70 {strides = array<i32>} : memref<128x16xf32, #tpu.memory_space<vmem>>, vector<128x16xf32>,
    return
  }
  func.func @transform_0(%arg0: i32) -> (i32, i32) {
    %c0_i32 = arith.constant 0 : i32
    %c0_i32_0 = arith.constant 0 : i32
    return %arg0, %c0_i32 : i32, i32
  }
  func.func @transform_1(%arg0: i32) -> (i32, i32) {
    %c0_i32 = arith.constant 0 : i32
    %c0_i32_0 = arith.constant 0 : i32
    %c0_i32_1 = arith.constant 0 : i32
    return %c0_i32, %c0_i32_0 : i32, i32
  }
  func.func @transform_2(%arg0: i32) -> (i32, i32) {
    %c0_i32 = arith.constant 0 : i32
    %c0_i32_0 = arith.constant 0 : i32
    %c0_i32_1 = arith.constant 0 : i32
    return %c0_i32, %c0_i32_0 : i32, i32
  }
  func.func @transform_3(%arg0: i32) -> (i32, i32) {
    %c0_i32 = arith.constant 0 : i32
    %c0_i32_0 = arith.constant 0 : i32
    %c0_i32_1 = arith.constant 0 : i32
    return %c0_i32, %c0_i32_0 : i32, i32
  }
  func.func @transform_4(%arg0: i32) -> (i32, i32) {
    %c0_i32 = arith.constant 0 : i32
    %c0_i32_0 = arith.constant 0 : i32
    %c0_i32_1 = arith.constant 0 : i32
    return %c0_i32, %c0_i32_0 : i32, i32
  }
  func.func @transform_5(%arg0: i32) -> (i32, i32) {
    %c0_i32 = arith.constant 0 : i32
    %c0_i32_0 = arith.constant 0 : i32
    %c0_i32_1 = arith.constant 0 : i32
    return %c0_i32, %c0_i32_0 : i32, i32
  }
  func.func @transform_6(%arg0: i32) -> (i32, i32) {
    %c0_i32 = arith.constant 0 : i32
    %c0_i32_0 = arith.constant 0 : i32
    %c0_i32_1 = arith.constant 0 : i32
    return %c0_i32, %c0_i32_0 : i32, i32
  }
  func.func @transform_7(%arg0: i32) -> (i32, i32) {
    %c0_i32 = arith.constant 0 : i32
    %c0_i32_0 = arith.constant 0 : i32
    %c0_i32_1 = arith.constant 0 : i32
    return %c0_i32, %c0_i32_0 : i32, i32
  }
  func.func @transform_8(%arg0: i32) -> (i32, i32) {
    %c0_i32 = arith.constant 0 : i32
    %c0_i32_0 = arith.constant 0 : i32
    %c0_i32_1 = arith.constant 0 : i32
    return %c0_i32, %c0_i32_0 : i32, i32
  }
  func.func @transform_9(%arg0: i32) -> (i32, i32) {
    %c0_i32 = arith.constant 0 : i32
    %c0_i32_0 = arith.constant 0 : i32
    %c0_i32_1 = arith.constant 0 : i32
    return %c0_i32, %c0_i32_0 : i32, i32
  }
  func.func @transform_10(%arg0: i32) -> (i32, i32) {
    %c0_i32 = arith.constant 0 : i32
    %c0_i32_0 = arith.constant 0 : i32
    %c0_i32_1 = arith.constant 0 : i32
    return %c0_i32, %c0_i32_0 : i32, i32
  }
  func.func @transform_11(%arg0: i32) -> (i32, i32) {
    %c0_i32 = arith.constant 0 : i32
    %c0_i32_0 = arith.constant 0 : i32
    return %arg0, %c0_i32 : i32, i32
  }
}

</mosaic_0001>

<bundles_post_ra>
// kernel: mlp_forward.1
= control target key start
LH: loop header
LB: loop body
LE: loop exit
PB: predicated region body
PF: predicated region fallthrough
CT: control target
= control target key end

     0   :  { %s1869_s17 = smov 0   ;;  %s2597_s0 = inlined_call_operand.vmem [shape: f32[256,32], index: 0, kind: input, shape index: {}]   ;;  %s2598_s1 = inlined_call_operand.vmem [shape: bf16[32,64], index: 1, kind: input, shape index: {}]   ;;  %s2599_s2 = inlined_call_operand.vmem [shape: f32[1,64], index: 2, kind: input, shape index: {}]   ;;  %s2600_s3 = inlined_call_operand.vmem [shape: f32[1,64], index: 3, kind: input, shape index: {}]   ;;  %s2601_s4 = inlined_call_operand.vmem [shape: f32[1,64], index: 4, kind: input, shape index: {}]   ;;  %s2602_s5 = inlined_call_operand.vmem [shape: bf16[64,32], index: 5, kind: input, shape index: {}]   ;;  %s2603_s6 = inlined_call_operand.vmem [shape: f32[1,32], index: 6, kind: input, shape index: {}]   ;;  %s2604_s7 = inlined_call_operand.vmem [shape: f32[1,32], index: 7, kind: input, shape index: {}]   ;;  %s2605_s8 = inlined_call_operand.vmem [shape: f32[1,32], index: 8, kind: input, shape index: {}]   ;;  %s2606_s9 = inlined_call_operand.vmem [shape: bf16[32,16], index: 9, kind: input, shape index: {}]   ;;  %s2607_s10 = inlined_call_operand.vmem [shape: f32[1,16], index: 10, kind: input, shape index: {}]   ;;  %s2608_s11 = inlined_call_operand.vmem [shape: f32[256,16], index: 11, kind: output, shape index: {}]  }
   0x1 LB: > { %s1631_s18 = sadd.s32 4294967295, %s1805_s17   ;;  %p1635_p0 = scmp.ge.s32.totalorder %s1805_s17, 1  ;;  %s1805_s17 = sphi %s1869_s17, %s21_s17  }
   0x2   : > { %p338_p1 = scmp.lt.s32.totalorder %s1805_s17, 3 }
   0x4   : > { %p339_p2 = pnand %p1635_p0, %p338_p1 }
   0x5   : > { %s1636_s21 = sshll.u32 (!%p339_p2), %s1631_s18, 4 }
   0x6   : > { %342 = sbr.rel (%p339_p2) target bundleno = 1234 (0x4d2), region = 64  ;;  %p379_p3 = scmp.lt.s32.totalorder (!%p339_p2), %s1636_s21, 31 }
   0xb   : > { %v1699_v0 = vld [vmem:[%s2598_s1 + $0x8] sm:$0xff]  ;;  %v1698_v1 = vld [vmem:[%s2598_s1] sm:$0xff]  ;;  %s2612_s21 = smov (!%p379_p3, %s1636_s21), 31  ;;  %vm437_vm0 = vcmask 261120   ;;  %vm511_vm1 = vcmask 523264   ;;  %v1807_v50 = vmov 64.0  }
   0xc   : > { %468 = vmatpush.bf16.msra.mxu0 %v1699_v0  ;;  %1706 = vmatpush.bf16.msra.mxu3 %v1699_v0  ;;  %s1637_s24 = sshll.u32 %s2612_s21, 3  ;;  %v1920_v26 = vld [vmem:[%s2599_s2] ss:$0 sm:$0xff]  ;;  %1731 = vrcp.f32 %v1807_v50 }
   0xd   : > { %s1891_s27 = scalar_lea.vmem %s2597_s0, %s1637_s24  ;;  %s2514_s23 = scalar_lea.vmem %s2608_s11, %s1637_s24 }
   0xe   : > { %v391_v2 = vld [vmem:[%s1891_s27] sm:$0xff]  ;;  %v392_v3 = vld [vmem:[%s1891_s27 + $0x8] sm:$0xff]  ;;  %v393_v5 = vld [vmem:[%s1891_s27 + $0x10] sm:$0xff] }
   0xf   : > { %v414_v4 = vpack.c.bf16 %v392_v3, %v391_v2  ;;  %v394_v6 = vld [vmem:[%s1891_s27 + $0x18] sm:$0xff]  ;;  %v395_v8 = vld [vmem:[%s1891_s27 + $0x20] sm:$0xff]  ;;  %v396_v9 = vld [vmem:[%s1891_s27 + $0x28] sm:$0xff] }
  0x10   : > { %469 = vmatpush.bf16.msra.mxu0 %v1698_v1  ;;  %1707 = vmatpush.bf16.msra.mxu3 %v1698_v1  ;;  %v415_v7 = vpack.c.bf16 %v394_v6, %v393_v5  ;;  %v416_v10 = vpack.c.bf16 %v396_v9, %v395_v8  ;;  %v397_v11 = vld [vmem:[%s1891_s27 + $0x30] sm:$0xff]  ;;  %v398_v12 = vld [vmem:[%s1891_s27 + $0x38] sm:$0xff]  ;;  %v399_v14 = vld [vmem:[%s1891_s27 + $0x40] sm:$0xff] }
  0x11   : > { %v417_v13 = vpack.c.bf16 %v398_v12, %v397_v11  ;;  %v400_v15 = vld [vmem:[%s1891_s27 + $0x48] sm:$0xff]  ;;  %v401_v17 = vld [vmem:[%s1891_s27 + $0x50] sm:$0xff]  ;;  %v402_v18 = vld [vmem:[%s1891_s27 + $0x58] sm:$0xff] }
  0x12   : > { %v418_v16 = vpack.c.bf16 %v400_v15, %v399_v14  ;;  %v419_v19 = vpack.c.bf16 %v402_v18, %v401_v17  ;;  %v403_v20 = vld [vmem:[%s1891_s27 + $0x60] sm:$0xff]  ;;  %v404_v21 = vld [vmem:[%s1891_s27 + $0x68] sm:$0xff]  ;;  %v405_v23 = vld [vmem:[%s1891_s27 + $0x70] sm:$0xff]  ;;  %v1732_v51 = vpop.eup %1731 }
  0x13   : > { %1648 = vmatmul.msk.bf16.vlgmr.msra.gmra.mxu0 %vm437_vm0, %v414_v4  ;;  %v420_v22 = vpack.c.bf16 %v404_v21, %v403_v20  ;;  %v406_v24 = vld [vmem:[%s1891_s27 + $0x78] sm:$0xff]  ;;  %v561_v53 = vmul.f32 64.0, %v1732_v51  ;;  %vm565_vm2 = vweird.f32 %v1732_v51 }
  0x14   : > { %v421_v25 = vpack.c.bf16 %v406_v24, %v405_v23 }
  0x15   : > { %v562_v54 = vsub.f32 1.0, %v561_v53 }
  0x16   : > { %1655 = vmatmul.msk.bf16.vlgmr.msra.gmra.mxu3 %vm437_vm0, %v421_v25 }
  0x17   : > { %v563_v55 = vmul.f32 %v1732_v51, %v562_v54 }
  0x19   : > { %v564_v57 = vadd.f32 %v1732_v51, %v563_v55 }
  0x1b   : > { %v1945_v58 = vsel %vm565_vm2, %v1732_v51, %v564_v57  ;;  %v1701_v57 = vld [vmem:[%s2602_s5 + $0x8] sm:$0xff] }
  0x23   : > { %1649 = vmatmul.msk.bf16.gmra.mxu0 %vm437_vm0, %v415_v7 }
  0x33   : > { %1650 = vmatmul.msk.bf16.gmra.mxu0 %vm437_vm0, %v416_v10 }
  0x43   : > { %1651 = vmatmul.msk.bf16.gmra.mxu0 %vm437_vm0, %v417_v13 }
  0x53   : > { %1652 = vmatmul.msk.bf16.gmra.mxu0 %vm437_vm0, %v418_v16 }
  0x63   : > { %1653 = vmatmul.msk.bf16.gmra.mxu0 %vm437_vm0, %v419_v19 }
  0x73   : > { %1654 = vmatmul.msk.bf16.gmra.mxu0 %vm437_vm0, %v420_v22 }
  0x90   : > { %v471_v27 = vpop.f32.mrf.mxu0 }
  0x91   : > { %v472_v28 = vadd.f32 %v1920_v26, %v471_v27 }
  0x93   : > { %v512_v29 = vsel %vm511_vm1, %v472_v28, 0.0 }
  0x94   : > { %513 = vadd.xlane.f32.xlu0 %v512_v29 }
  0x98   : > { %v473_v30 = vpop.f32.mrf.mxu0 }
  0x99   : > { %v474_v31 = vadd.f32 %v1920_v26, %v473_v30  ;;  %v506_v22 = vpop.f32.mrf.mxu3 }
  0x9a   : > { %v2026_v50 = vadd.f32 %v1920_v26, %v506_v22 }
  0x9b   : > { %v515_v32 = vsel %vm511_vm1, %v474_v31, 0.0 }
  0x9c   : > { %516 = vadd.xlane.f32.xlu0 %v515_v32 }
  0xa0   : > { %v476_v33 = vpop.f32.mrf.mxu0 }
  0xa1   : > { %v477_v34 = vadd.f32 %v1920_v26, %v476_v33 }
  0xa3   : > { %v518_v35 = vsel %vm511_vm1, %v477_v34, 0.0 }
  0xa4   : > { %519 = vadd.xlane.f32.xlu1 %v518_v35 }
  0xa8   : > { %v478_v36 = vpop.f32.mrf.mxu0 }
  0xa9   : > { %v479_v37 = vadd.f32 %v1920_v26, %v478_v36  ;;  %v508_v36 = vpop.f32.mrf.mxu3 }
  0xab   : > { %v521_v38 = vsel %vm511_vm1, %v479_v37, 0.0 }
  0xac   : > { %522 = vadd.xlane.f32.xlu1 %v521_v38 }
  0xb0   : > { %v481_v39 = vpop.f32.mrf.mxu0 }
  0xb1   : > { %v1931_v40 = vadd.f32 %v1920_v26, %v481_v39 }
  0xb3   : > { %v524_v41 = vsel %vm511_vm1, %v1931_v40, 0.0 }
  0xb4   : > { %525 = vadd.xlane.f32.xlu2 %v524_v41 }
  0xb8   : > { %v483_v42 = vpop.f32.mrf.mxu0 }
  0xb9   : > { %v1936_v43 = vadd.f32 %v1920_v26, %v483_v42 }
  0xbb   : > { %v527_v44 = vsel %vm511_vm1, %v1936_v43, 0.0 }
  0xbc   : > { %528 = vadd.xlane.f32.xlu2 %v527_v44 }
  0xc0   : > { %v486_v45 = vpop.f32.mrf.mxu0 }
  0xc1   : > { %v1941_v46 = vadd.f32 %v1920_v26, %v486_v45 }
  0xc3   : > { %v530_v47 = vsel %vm511_vm1, %v1941_v46, 0.0 }
  0xc4   : > { %531 = vadd.xlane.f32.xlu2 %v530_v47 }
  0xc8   : > { %v488_v48 = vpop.f32.mrf.mxu0 }
  0xc9   : > { %v1955_v3 = vadd.f32 %v1920_v26, %v488_v48 }
  0xcb   : > { %v533_v7 = vsel %vm511_vm1, %v1955_v3, 0.0 }
  0xd0   : > { %v491_v49 = vpop.f32.mrf.mxu0 }
  0xd1   : > { %v1965_v10 = vadd.f32 %v1920_v26, %v491_v49 }
  0xd3   : > { %v536_v13 = vsel %vm511_vm1, %v1965_v10, 0.0 }
  0xd8   : > { %v493_v52 = vpop.f32.mrf.mxu0 }
  0xd9   : > { %v1980_v20 = vadd.f32 %v1920_v26, %v493_v52  ;;  %v554_v52 = vsel %vm511_vm1, %v2026_v50, 0.0 }
  0xdb   : > { %v539_v25 = vsel %vm511_vm1, %v1980_v20, 0.0 }
  0xe0   : > { %v496_v56 = vpop.f32.mrf.mxu0 }
  0xe1   : > { %v1992_v29 = vadd.f32 %v1920_v26, %v496_v56 }
  0xe8   : > { %v498_v61 = vpop.f32.mrf.mxu0 }
  0xe9   : > { %v2013_v41 = vadd.f32 %v1920_v26, %v498_v61 }
  0xeb   : > { %v545_v47 = vsel %vm511_vm1, %v2013_v41, 0.0 }
  0xf0   : > { %v501_v5 = vpop.f32.mrf.mxu0 }
  0xf1   : > { %v1995_v30 = vadd.f32 %v1920_v26, %v501_v5 }
  0xf3   : > { %v548_v33 = vsel %vm511_vm1, %v1995_v30, 0.0 }
  0xf8   : > { %v503_v15 = vpop.f32.mrf.mxu0 }
  0xf9   : > { %v1977_v19 = vadd.f32 %v1920_v26, %v503_v15 }
  0xfb   : > { %v551_v24 = vsel %vm511_vm1, %v1977_v19, 0.0 }
 0x107   : > { %v514_v59 = vpop.xlane.xlu0 %513 }
 0x108   : > { %v567_v60 = vmul.f32 %v1945_v58, %v514_v59 }
 0x10a   : > { %v1948_v62 = vsub.f32 %v472_v28, %v567_v60  ;;  %v1700_v60 = vld [vmem:[%s2602_s5] sm:$0xff] }
 0x10c   : > { %v599_v63 = vmul.f32 %v1948_v62, %v1948_v62 }
 0x10e   : > { %v615_v0 = vsel %vm511_vm1, %v599_v63, 0.0 }
 0x10f   : > { %616 = vadd.xlane.f32.xlu0 %v615_v0  ;;  %v517_v1 = vpop.xlane.xlu0 %516 }
 0x110   : > { %v568_v2 = vmul.f32 %v1945_v58, %v517_v1 }
 0x112   : > { %v1957_v4 = vsub.f32 %v474_v31, %v568_v2 }
 0x114   : > { %v600_v6 = vmul.f32 %v1957_v4, %v1957_v4 }
 0x116   : > { %v618_v8 = vsel %vm511_vm1, %v600_v6, 0.0 }
 0x117   : > { %v520_v9 = vpop.xlane.xlu1 %519  ;;  %534 = vadd.xlane.f32.xlu0 %v533_v7  ;;  %619 = vadd.xlane.f32.xlu1 %v618_v8 }
 0x118   : > { %v569_v11 = vmul.f32 %v1945_v58, %v520_v9 }
 0x11a   : > { %v1968_v12 = vsub.f32 %v477_v34, %v569_v11  ;;  %v542_v34 = vsel %vm511_vm1, %v1992_v29, 0.0 }
 0x11c   : > { %v601_v14 = vmul.f32 %v1968_v12, %v1968_v12 }
 0x11e   : > { %v621_v16 = vsel %vm511_vm1, %v601_v14, 0.0 }
 0x11f   : > { %v523_v17 = vpop.xlane.xlu1 %522  ;;  %537 = vadd.xlane.f32.xlu0 %v536_v13  ;;  %622 = vadd.xlane.f32.xlu1 %v621_v16 }
 0x120   : > { %v570_v18 = vmul.f32 %v1945_v58, %v523_v17 }
 0x122   : > { %v1982_v21 = vsub.f32 %v479_v37, %v570_v18 }
 0x124   : > { %v602_v23 = vmul.f32 %v1982_v21, %v1982_v21 }
 0x126   : > { %v624_v27 = vsel %vm511_vm1, %v602_v23, 0.0 }
 0x127   : > { %v526_v28 = vpop.xlane.xlu2 %525  ;;  %625 = vadd.xlane.f32.xlu2 %v624_v27  ;;  %552 = vadd.xlane.f32.xlu0 %v551_v24 }
 0x128   : > { %v571_v31 = vmul.f32 %v1945_v58, %v526_v28  ;;  %540 = vadd.xlane.f32.xlu1 %v539_v25 }
 0x12a   : > { %v1999_v32 = vsub.f32 %v1931_v40, %v571_v31  ;;  %v2010_v40 = vadd.f32 %v1920_v26, %v508_v36  ;;  %v1703_v26 = vld [vmem:[%s2602_s5 + $0x18] sm:$0xff] }
 0x12b   : > { %999 = vmatpush.bf16.msra.mxu1 %v1703_v26  ;;  %1708 = vmatpush.bf16.msrb.mxu3 %v1703_v26 }
 0x12c   : > { %v603_v35 = vmul.f32 %v1999_v32, %v1999_v32  ;;  %v557_v45 = vsel %vm511_vm1, %v2010_v40, 0.0 }
 0x12e   : > { %v627_v37 = vsel %vm511_vm1, %v603_v35, 0.0 }
 0x12f   : > { %v529_v38 = vpop.xlane.xlu2 %528  ;;  %549 = vadd.xlane.f32.xlu2 %v548_v33  ;;  %543 = vadd.xlane.f32.xlu0 %v542_v34 }
 0x130   : > { %v572_v39 = vmul.f32 %v1945_v58, %v529_v38  ;;  %628 = vadd.xlane.f32.xlu1 %v627_v37 }
 0x132   : > { %v2016_v42 = vsub.f32 %v1936_v43, %v572_v39 }
 0x134   : > { %v604_v44 = vmul.f32 %v2016_v42, %v2016_v42 }
 0x136   : > { %v630_v48 = vsel %vm511_vm1, %v604_v44, 0.0  ;;  %v2072_v44 = vld [vmem:[%s2600_s3] ss:$0 sm:$0xff] }
 0x137   : > { %v532_v49 = vpop.xlane.xlu2 %531  ;;  %631 = vadd.xlane.f32.xlu2 %v630_v48  ;;  %558 = vadd.xlane.f32.xlu0 %v557_v45 }
 0x138   : > { %v573_v43 = vmul.f32 %v1945_v58, %v532_v49  ;;  %546 = vadd.xlane.f32.xlu1 %v545_v47 }
 0x13a   : > { %v2030_v51 = vsub.f32 %v1941_v46, %v573_v43  ;;  %v1702_v46 = vld [vmem:[%s2602_s5 + $0x10] sm:$0xff] }
 0x13b   : > { %1000 = vmatpush.bf16.msra.mxu1 %v1702_v46  ;;  %1709 = vmatpush.bf16.msrb.mxu3 %v1702_v46  ;;  %v2090_v46 = vld [vmem:[%s2601_s4] ss:$0 sm:$0xff] }
 0x13c   : > { %v605_v53 = vmul.f32 %v2030_v51, %v2030_v51 }
 0x13e   : > { %v633_v54 = vsel %vm511_vm1, %v605_v53, 0.0 }
 0x13f   : > { %555 = vadd.xlane.f32.xlu2 %v554_v52  ;;  %1001 = vmatpush.bf16.msra.mxu1 %v1701_v57 }
 0x140   : > { %634 = vadd.xlane.f32.xlu1 %v633_v54  ;;  %1710 = vmatpush.bf16.msrb.mxu3 %v1701_v57 }
 0x143   : > { %1002 = vmatpush.bf16.msra.mxu1 %v1700_v60 }
 0x144   : > { %1711 = vmatpush.bf16.msrb.mxu3 %v1700_v60 }
 0x182   : > { %v617_v55 = vpop.xlane.xlu0 %616 }
 0x183   : > { %v663_v56 = vmul.f32 %v617_v55, %v1945_v58 }
 0x185   : > { %v679_v59 = vadd.f32 1e-05, %v663_v56 }
 0x187   : > { %1733 = vrsqrt.f32 %v679_v59  ;;  %vm701_vm4 = vweird.f32 %v679_v59 }
 0x18a   : > { %v620_v61 = vpop.xlane.xlu1 %619  ;;  %v535_v63 = vpop.xlane.xlu0 %534 }
 0x18b   : > { %v664_v0 = vmul.f32 %v620_v61, %v1945_v58  ;;  %v574_v1 = vmul.f32 %v1945_v58, %v535_v63 }
 0x18d   : > { %v1734_v2 = vpop.eup %1733  ;;  %v680_v5 = vadd.f32 1e-05, %v664_v0  ;;  %v2053_v6 = vsub.f32 %v1955_v3, %v574_v1 }
 0x18e   : > { %v696_v7 = vmul.f32 %v1734_v2, %v679_v59  ;;  %vm702_vm3 = vweird.f32 %v1734_v2 }
 0x18f   : > { %1735 = vrsqrt.f32 %v680_v5  ;;  %v606_v8 = vmul.f32 %v2053_v6, %v2053_v6  ;;  %vm703_vm5 = vmor %vm701_vm4, %vm702_vm3  ;;  %vm711_vm7 = vweird.f32 %v680_v5 }
 0x190   : > { %v697_v9 = vmul.f32 %v1734_v2, %v696_v7 }
 0x191   : > { %v636_v11 = vsel %vm511_vm1, %v606_v8, 0.0 }
 0x192   : > { %v698_v13 = vmul.f32 0.5, %v697_v9  ;;  %v623_v14 = vpop.xlane.xlu1 %622  ;;  %637 = vadd.xlane.f32.xlu2 %v636_v11  ;;  %v538_v15 = vpop.xlane.xlu0 %537 }
 0x193   : > { %v665_v16 = vmul.f32 %v623_v14, %v1945_v58  ;;  %v575_v17 = vmul.f32 %v1945_v58, %v538_v15 }
 0x194   : > { %v699_v18 = vsub.f32 1.5, %v698_v13 }
 0x195   : > { %v1736_v3 = vpop.eup %1735  ;;  %v681_v22 = vadd.f32 1e-05, %v665_v16  ;;  %v2061_v23 = vsub.f32 %v1965_v10, %v575_v17 }
 0x196   : > { %v700_v24 = vmul.f32 %v1734_v2, %v699_v18  ;;  %v706_v25 = vmul.f32 %v1736_v3, %v680_v5  ;;  %vm712_vm6 = vweird.f32 %v1736_v3 }
 0x197   : > { %1737 = vrsqrt.f32 %v681_v22  ;;  %v607_v27 = vmul.f32 %v2061_v23, %v2061_v23  ;;  %vm713_vm8 = vmor %vm711_vm7, %vm712_vm6  ;;  %vm721_vm10 = vweird.f32 %v681_v22 }
 0x198   : > { %v704_v28 = vsel %vm703_vm5, %v1734_v2, %v700_v24  ;;  %v707_v31 = vmul.f32 %v1736_v3, %v706_v25 }
 0x199   : > { %v639_v33 = vsel %vm511_vm1, %v607_v27, 0.0  ;;  %v855_v37 = vmul.f32 %v704_v28, %v1948_v62 }
 0x19a   : > { %v708_v34 = vmul.f32 0.5, %v707_v31  ;;  %v626_v35 = vpop.xlane.xlu2 %625  ;;  %640 = vadd.xlane.f32.xlu0 %v639_v33  ;;  %v553_v36 = vpop.xlane.xlu0 %552 }
 0x19b   : > { %v666_v10 = vmul.f32 %v626_v35, %v1945_v58  ;;  %v541_v38 = vpop.xlane.xlu1 %540  ;;  %v580_v39 = vmul.f32 %v1945_v58, %v553_v36  ;;  %v874_v26 = vmul.f32 %v2072_v44, %v855_v37 }
 0x19c   : > { %v709_v45 = vsub.f32 1.5, %v708_v34  ;;  %v576_v47 = vmul.f32 %v1945_v58, %v541_v38 }
 0x19d   : > { %v1738_v48 = vpop.eup %1737  ;;  %v2075_v49 = vadd.f32 1e-05, %v666_v10  ;;  %v2078_v43 = vsub.f32 %v1977_v19, %v580_v39  ;;  %v893_v7 = vadd.f32 %v2090_v46, %v874_v26 }
 0x19e   : > { %v710_v62 = vmul.f32 %v1736_v3, %v709_v45  ;;  %v716_v52 = vmul.f32 %v1738_v48, %v681_v22  ;;  %v2081_v53 = vsub.f32 %v1980_v20, %v576_v47  ;;  %vm722_vm9 = vweird.f32 %v1738_v48 }
 0x19f   : > { %1739 = vrsqrt.f32 %v2075_v49  ;;  %v612_v54 = vmul.f32 %v2078_v43, %v2078_v43  ;;  %vm723_vm11 = vmor %vm721_vm10, %vm722_vm9  ;;  %v909_v24 = vmax.f32 %v893_v7, 0.0  ;;  %vm731_vm13 = vweird.f32 %v2075_v49 }
 0x1a0   : > { %v714_v19 = vsel %vm713_vm8, %v1736_v3, %v710_v62  ;;  %v717_v55 = vmul.f32 %v1738_v48, %v716_v52  ;;  %v608_v56 = vmul.f32 %v2081_v53, %v2081_v53 }
 0x1a1   : > { %v856_v20 = vmul.f32 %v714_v19, %v1957_v4  ;;  %v654_v57 = vsel %vm511_vm1, %v612_v54, 0.0 }
 0x1a2   : > { %v718_v59 = vmul.f32 0.5, %v717_v55  ;;  %v550_v60 = vpop.xlane.xlu2 %549  ;;  %v642_v61 = vsel %vm511_vm1, %v608_v56, 0.0  ;;  %655 = vadd.xlane.f32.xlu0 %v654_v57  ;;  %v544_v63 = vpop.xlane.xlu0 %543 }
 0x1a3   : > { %v579_v0 = vmul.f32 %v1945_v58, %v550_v60  ;;  %643 = vadd.xlane.f32.xlu1 %v642_v61  ;;  %v629_v1 = vpop.xlane.xlu1 %628  ;;  %v577_v2 = vmul.f32 %v1945_v58, %v544_v63  ;;  %v875_v5 = vmul.f32 %v2072_v44, %v856_v20 }
 0x1a4   : > { %v719_v8 = vsub.f32 1.5, %v718_v59  ;;  %v667_v4 = vmul.f32 %v629_v1, %v1945_v58 }
 0x1a5   : > { %v1740_v9 = vpop.eup %1739  ;;  %v2103_v11 = vsub.f32 %v1995_v30, %v579_v0  ;;  %v2106_v13 = vsub.f32 %v1992_v29, %v577_v2  ;;  %v894_v14 = vadd.f32 %v2090_v46, %v875_v5 }
 0x1a6   : > { %v720_v15 = vmul.f32 %v1738_v48, %v719_v8  ;;  %v726_v16 = vmul.f32 %v1740_v9, %v2075_v49  ;;  %v683_v17 = vadd.f32 1e-05, %v667_v4  ;;  %vm732_vm12 = vweird.f32 %v1740_v9 }
 0x1a7   : > { %v611_v18 = vmul.f32 %v2103_v11, %v2103_v11  ;;  %v609_v3 = vmul.f32 %v2106_v13, %v2106_v13  ;;  %v910_v30 = vmax.f32 %v894_v14, 0.0  ;;  %vm733_vm14 = vmor %vm731_vm13, %vm732_vm12 }
 0x1a8   : > { %v724_v25 = vsel %vm723_vm11, %v1738_v48, %v720_v15  ;;  %v727_v27 = vmul.f32 %v1740_v9, %v726_v16  ;;  %1741 = vrsqrt.f32 %v683_v17  ;;  %vm741_vm2 = vweird.f32 %v683_v17 }
 0x1a9   : > { %v651_v29 = vsel %vm511_vm1, %v611_v18, 0.0  ;;  %v645_v28 = vsel %vm511_vm1, %v609_v3, 0.0  ;;  %v936_v22 = vpack.c.bf16 %v910_v30, %v909_v24  ;;  %v857_v35 = vmul.f32 %v724_v25, %v1968_v12 }
 0x1aa   : > { %v728_v31 = vmul.f32 0.5, %v727_v27  ;;  %v632_v33 = vpop.xlane.xlu2 %631  ;;  %652 = vadd.xlane.f32.xlu2 %v651_v29  ;;  %v559_v34 = vpop.xlane.xlu0 %558 }
 0x1ab   : > { %v668_v36 = vmul.f32 %v632_v33, %v1945_v58  ;;  %v547_v37 = vpop.xlane.xlu1 %546  ;;  %646 = vadd.xlane.f32.xlu1 %v645_v28  ;;  %v582_v10 = vmul.f32 %v1945_v58, %v559_v34  ;;  %1672 = vmatmul.msk.bf16.vlgmr.msra.gmra.mxu1 %vm511_vm1, %v936_v22  ;;  %v876_v54 = vmul.f32 %v2072_v44, %v857_v35 }
 0x1ac   : > { %v729_v38 = vsub.f32 1.5, %v728_v31  ;;  %v578_v39 = vmul.f32 %v1945_v58, %v547_v37 }
 0x1ad   : > { %v684_v45 = vadd.f32 1e-05, %v668_v36  ;;  %v2122_v47 = vsub.f32 %v2010_v40, %v582_v10  ;;  %v895_v61 = vadd.f32 %v2090_v46, %v876_v54 }
 0x1ae   : > { %v1742_v48 = vpop.eup %1741  ;;  %v730_v62 = vmul.f32 %v1740_v9, %v729_v38  ;;  %v2126_v12 = vsub.f32 %v2013_v41, %v578_v39 }
 0x1af   : > { %v736_v52 = vmul.f32 %v1742_v48, %v683_v17  ;;  %1743 = vrsqrt.f32 %v684_v45  ;;  %v614_v40 = vmul.f32 %v2122_v47, %v2122_v47  ;;  %vm742_vm15 = vweird.f32 %v1742_v48 }
 0x1b0   : > { %v734_v26 = vsel %vm733_vm14, %v1740_v9, %v730_v62  ;;  %v610_v19 = vmul.f32 %v2126_v12, %v2126_v12  ;;  %v911_v8 = vmax.f32 %v895_v61, 0.0  ;;  %vm743_vm3 = vmor %vm741_vm2, %vm742_vm15  ;;  %vm751_vm5 = vweird.f32 %v684_v45 }
 0x1b1   : > { %v858_v55 = vmul.f32 %v734_v26, %v1982_v21  ;;  %v737_v56 = vmul.f32 %v1742_v48, %v736_v52  ;;  %v660_v41 = vsel %vm511_vm1, %v614_v40, 0.0 }
 0x1b2   : > { %v556_v20 = vpop.xlane.xlu2 %555  ;;  %v648_v49 = vsel %vm511_vm1, %v610_v19, 0.0 }
 0x1b3   : > { %v738_v57 = vmul.f32 0.5, %v737_v56  ;;  %v581_v59 = vmul.f32 %v1945_v58, %v556_v20  ;;  %649 = vadd.xlane.f32.xlu2 %v648_v49  ;;  %661 = vadd.xlane.f32.xlu1 %v660_v41  ;;  %v877_v60 = vmul.f32 %v2072_v44, %v858_v55  ;;  %v635_v33 = vpop.xlane.xlu1 %634 }
 0x1b4   : > { %v669_v34 = vmul.f32 %v635_v33, %v1945_v58 }
 0x1b5   : > { %v1744_v63 = vpop.eup %1743  ;;  %v739_v0 = vsub.f32 1.5, %v738_v57  ;;  %v2140_v21 = vsub.f32 %v2026_v50, %v581_v59  ;;  %v896_v1 = vadd.f32 %v2090_v46, %v877_v60 }
 0x1b6   : > { %v746_v2 = vmul.f32 %v1744_v63, %v684_v45  ;;  %vm752_vm4 = vweird.f32 %v1744_v63  ;;  %v685_v35 = vadd.f32 1e-05, %v669_v34 }
 0x1b7   : > { %v740_v5 = vmul.f32 %v1742_v48, %v739_v0  ;;  %v613_v7 = vmul.f32 %v2140_v21, %v2140_v21  ;;  %v912_v4 = vmax.f32 %v896_v1, 0.0  ;;  %vm753_vm6 = vmor %vm751_vm5, %vm752_vm4 }
 0x1b8   : > { %v747_v9 = vmul.f32 %v1744_v63, %v746_v2  ;;  %1745 = vrsqrt.f32 %v685_v35  ;;  %vm761_vm8 = vweird.f32 %v685_v35 }
 0x1b9   : > { %v744_v14 = vsel %vm743_vm3, %v1742_v48, %v740_v5  ;;  %v657_v15 = vsel %vm511_vm1, %v613_v7, 0.0  ;;  %v937_v16 = vpack.c.bf16 %v912_v4, %v911_v8 }
 0x1ba   : > { %v748_v18 = vmul.f32 0.5, %v747_v9  ;;  %658 = vadd.xlane.f32.xlu0 %v657_v15  ;;  %v859_v50 = vmul.f32 %v744_v14, %v1999_v32 }
 0x1bb   : > { %1673 = vmatmul.msk.bf16.gmra.mxu1 %vm511_vm1, %v937_v16 }
 0x1bc   : > { %v749_v17 = vsub.f32 1.5, %v748_v18  ;;  %v878_v24 = vmul.f32 %v2072_v44, %v859_v50 }
 0x1be   : > { %v750_v3 = vmul.f32 %v1744_v63, %v749_v17  ;;  %v897_v29 = vadd.f32 %v2090_v46, %v878_v24  ;;  %v1746_v36 = vpop.eup %1745 }
 0x1bf   : > { %v756_v37 = vmul.f32 %v1746_v36, %v685_v35  ;;  %vm762_vm7 = vweird.f32 %v1746_v36 }
 0x1c0   : > { %v754_v30 = vsel %vm753_vm6, %v1744_v63, %v750_v3  ;;  %v913_v22 = vmax.f32 %v897_v29, 0.0  ;;  %vm763_vm9 = vmor %vm761_vm8, %vm762_vm7 }
 0x1c1   : > { %v860_v25 = vmul.f32 %v754_v30, %v2016_v42  ;;  %v757_v10 = vmul.f32 %v1746_v36, %v756_v37 }
 0x1c3   : > { %v879_v27 = vmul.f32 %v2072_v44, %v860_v25  ;;  %v758_v45 = vmul.f32 0.5, %v757_v10 }
 0x1c5   : > { %v898_v28 = vadd.f32 %v2090_v46, %v879_v27  ;;  %v759_v48 = vsub.f32 1.5, %v758_v45 }
 0x1c7   : > { %v914_v32 = vmax.f32 %v898_v28, 0.0  ;;  %v760_v19 = vmul.f32 %v1746_v36, %v759_v48 }
 0x1c9   : > { %v938_v31 = vpack.c.bf16 %v914_v32, %v913_v22  ;;  %v764_v56 = vsel %vm763_vm9, %v1746_v36, %v760_v19 }
 0x1ca   : > { %v861_v63 = vmul.f32 %v764_v56, %v2030_v51 }
 0x1cb   : > { %1674 = vmatmul.msk.bf16.gmra.mxu1 %vm511_vm1, %v938_v31 }
 0x1cc   : > { %v880_v9 = vmul.f32 %v2072_v44, %v861_v63 }
 0x1ce   : > { %v899_v30 = vadd.f32 %v2090_v46, %v880_v9 }
 0x1d0   : > { %v915_v33 = vmax.f32 %v899_v30, 0.0 }
 0x205   : > { %v638_v42 = vpop.xlane.xlu2 %637 }
 0x206   : > { %v670_v38 = vmul.f32 %v638_v42, %v1945_v58 }
 0x208   : > { %v686_v39 = vadd.f32 1e-05, %v670_v38 }
 0x20a   : > { %1747 = vrsqrt.f32 %v686_v39  ;;  %vm771_vm11 = vweird.f32 %v686_v39 }
 0x20d   : > { %v641_v62 = vpop.xlane.xlu0 %640 }
 0x20e   : > { %v671_v52 = vmul.f32 %v641_v62, %v1945_v58 }
 0x210   : > { %v1748_v54 = vpop.eup %1747  ;;  %v687_v26 = vadd.f32 1e-05, %v671_v52 }
 0x211   : > { %v766_v40 = vmul.f32 %v1748_v54, %v686_v39  ;;  %vm772_vm10 = vweird.f32 %v1748_v54 }
 0x212   : > { %1749 = vrsqrt.f32 %v687_v26  ;;  %vm773_vm12 = vmor %vm771_vm11, %vm772_vm10  ;;  %vm781_vm14 = vweird.f32 %v687_v26 }
 0x213   : > { %v767_v55 = vmul.f32 %v1748_v54, %v766_v40 }
 0x215   : > { %v768_v20 = vmul.f32 0.5, %v767_v55  ;;  %v656_v49 = vpop.xlane.xlu0 %655 }
 0x216   : > { %v644_v41 = vpop.xlane.xlu1 %643  ;;  %v676_v57 = vmul.f32 %v656_v49, %v1945_v58  ;;  %v2191_v49 = vld [vmem:[%s2603_s6] ss:$0 sm:$0xff] }
 0x217   : > { %v769_v59 = vsub.f32 1.5, %v768_v20  ;;  %v672_v60 = vmul.f32 %v644_v41, %v1945_v58 }
 0x218   : > { %v1750_v61 = vpop.eup %1749  ;;  %v692_v0 = vadd.f32 1e-05, %v676_v57 }
 0x219   : > { %v770_v1 = vmul.f32 %v1748_v54, %v769_v59  ;;  %v776_v2 = vmul.f32 %v1750_v61, %v687_v26  ;;  %v688_v5 = vadd.f32 1e-05, %v672_v60  ;;  %vm782_vm13 = vweird.f32 %v1750_v61 }
 0x21a   : > { %1751 = vrsqrt.f32 %v692_v0  ;;  %vm2173_vm15 = vmor %vm781_vm14, %vm782_vm13  ;;  %vm831_vm4 = vweird.f32 %v692_v0 }
 0x21b   : > { %v774_v7 = vsel %vm773_vm12, %v1748_v54, %v770_v1  ;;  %v777_v8 = vmul.f32 %v1750_v61, %v776_v2  ;;  %1753 = vrsqrt.f32 %v688_v5  ;;  %vm791_vm5 = vweird.f32 %v688_v5 }
 0x21c   : > { %v862_v4 = vmul.f32 %v774_v7, %v2053_v6 }
 0x21d   : > { %v778_v14 = vmul.f32 0.5, %v777_v8  ;;  %v653_v15 = vpop.xlane.xlu2 %652 }
 0x21e   : > { %v675_v16 = vmul.f32 %v653_v15, %v1945_v58  ;;  %v647_v18 = vpop.xlane.xlu1 %646  ;;  %v881_v51 = vmul.f32 %v2072_v44, %v862_v4 }
 0x21f   : > { %v779_v50 = vsub.f32 1.5, %v778_v14  ;;  %v673_v17 = vmul.f32 %v647_v18, %v1945_v58 }
 0x220   : > { %v1752_v3 = vpop.eup %1751  ;;  %v2165_v24 = vadd.f32 1e-05, %v675_v16  ;;  %v900_v25 = vadd.f32 %v2090_v46, %v881_v51 }
 0x221   : > { %v1754_v6 = vpop.eup %1753  ;;  %v826_v27 = vmul.f32 %v1752_v3, %v692_v0  ;;  %v2169_v29 = vadd.f32 1e-05, %v673_v17  ;;  %v780_v28 = vmul.f32 %v1750_v61, %v779_v50  ;;  %vm832_vm2 = vweird.f32 %v1752_v3 }
 0x222   : > { %v786_v22 = vmul.f32 %v1754_v6, %v688_v5  ;;  %1755 = vrsqrt.f32 %v2165_v24  ;;  %v916_v34 = vmax.f32 %v900_v25, 0.0  ;;  %vm792_vm3 = vweird.f32 %v1754_v6  ;;  %vm833_vm6 = vmor %vm831_vm4, %vm832_vm2 }
 0x223   : > { %v827_v32 = vmul.f32 %v1752_v3, %v826_v27  ;;  %1757 = vrsqrt.f32 %v2169_v29  ;;  %v784_v37 = vsel %vm2173_vm15, %v1750_v61, %v780_v28  ;;  %vm793_vm7 = vmor %vm791_vm5, %vm792_vm3  ;;  %vm821_vm8 = vweird.f32 %v2165_v24 }
 0x224   : > { %v787_v31 = vmul.f32 %v1754_v6, %v786_v22  ;;  %v939_v39 = vpack.c.bf16 %v916_v34, %v915_v33  ;;  %v863_v40 = vmul.f32 %v784_v37, %v2061_v23  ;;  %vm801_vm10 = vweird.f32 %v2169_v29 }
 0x225   : > { %v828_v36 = vmul.f32 0.5, %v827_v32 }
 0x226   : > { %v788_v10 = vmul.f32 0.5, %v787_v31  ;;  %v650_v42 = vpop.xlane.xlu2 %649  ;;  %v662_v38 = vpop.xlane.xlu1 %661  ;;  %1675 = vmatmul.msk.bf16.gmra.mxu1 %vm511_vm1, %v939_v39  ;;  %v882_v7 = vmul.f32 %v2072_v44, %v863_v40 }
 0x227   : > { %v829_v45 = vsub.f32 1.5, %v828_v36  ;;  %v674_v48 = vmul.f32 %v650_v42, %v1945_v58  ;;  %v678_v62 = vmul.f32 %v662_v38, %v1945_v58 }
 0x228   : > { %v1756_v52 = vpop.eup %1755  ;;  %v789_v54 = vsub.f32 1.5, %v788_v10  ;;  %v1004_v26 = vpop.f32.mrf.mxu1  ;;  %v901_v17 = vadd.f32 %v2090_v46, %v882_v7 }
 0x229   : > { %v2182_v19 = vpop.eup %1757  ;;  %v830_v55 = vmul.f32 %v1752_v3, %v829_v45  ;;  %v816_v56 = vmul.f32 %v1756_v52, %v2165_v24  ;;  %v2186_v20 = vadd.f32 1e-05, %v674_v48  ;;  %v2196_v59 = vadd.f32 1e-05, %v678_v62 }
 0x22a   : > { %v790_v41 = vmul.f32 %v1754_v6, %v789_v54  ;;  %v796_v57 = vmul.f32 %v2182_v19, %v2169_v29  ;;  %v2204_v2 = vadd.f32 %v2191_v49, %v1004_v26  ;;  %vm822_vm9 = vweird.f32 %v1756_v52 }
 0x22b   : > { %v834_v23 = vsel %vm833_vm6, %v1752_v3, %v830_v55  ;;  %v817_v60 = vmul.f32 %v1756_v52, %v816_v56  ;;  %1759 = vrsqrt.f32 %v2186_v20  ;;  %vm802_vm11 = vweird.f32 %v2182_v19  ;;  %vm823_vm12 = vmor %vm821_vm8, %vm822_vm9 }
 0x22c   : > { %v794_v61 = vsel %vm793_vm7, %v1754_v6, %v790_v41  ;;  %v797_v63 = vmul.f32 %v2182_v19, %v796_v57  ;;  %1761 = vrsqrt.f32 %v2196_v59  ;;  %v868_v8 = vmul.f32 %v834_v23, %v2078_v43  ;;  %vm803_vm13 = vmor %vm801_vm10, %vm802_vm11 }
 0x22d   : > { %v864_v0 = vmul.f32 %v794_v61, %v2081_v53  ;;  %v818_v1 = vmul.f32 0.5, %v817_v60  ;;  %v659_v5 = vpop.xlane.xlu0 %658  ;;  %v1044_v15 = vsel %vm437_vm0, %v2204_v2, 0.0  ;;  %v917_v35 = vmax.f32 %v901_v17, 0.0 }
 0x22e   : > { %v798_v4 = vmul.f32 0.5, %v797_v63  ;;  %v677_v9 = vmul.f32 %v659_v5, %v1945_v58  ;;  %1045 = vadd.xlane.f32.xlu2 %v1044_v15  ;;  %v887_v25 = vmul.f32 %v2072_v44, %v868_v8  ;;  %vm811_vm14 = vweird.f32 %v2186_v20 }
 0x22f   : > { %v819_v14 = vsub.f32 1.5, %v818_v1  ;;  %v883_v53 = vmul.f32 %v2072_v44, %v864_v0  ;;  %vm851_vm3 = vweird.f32 %v2196_v59 }
 0x230   : > { %v799_v16 = vsub.f32 1.5, %v798_v4  ;;  %v2215_v18 = vadd.f32 1e-05, %v677_v9  ;;  %v1006_v43 = vpop.f32.mrf.mxu1  ;;  %v906_v29 = vadd.f32 %v2090_v46, %v887_v25 }
 0x231   : > { %v1760_v51 = vpop.eup %1759  ;;  %v820_v50 = vmul.f32 %v1756_v52, %v819_v14  ;;  %v2218_v58 = vadd.f32 %v2191_v49, %v1006_v43  ;;  %v902_v3 = vadd.f32 %v2090_v46, %v883_v53 }
 0x232   : > { %v1762_v30 = vpop.eup %1761  ;;  %v800_v6 = vmul.f32 %v2182_v19, %v799_v16  ;;  %v806_v27 = vmul.f32 %v1760_v51, %v2186_v20  ;;  %1763 = vrsqrt.f32 %v2215_v18  ;;  %vm812_vm15 = vweird.f32 %v1760_v51 }
 0x233   : > { %v824_v28 = vsel %vm823_vm12, %v1756_v52, %v820_v50  ;;  %v846_v22 = vmul.f32 %v1762_v30, %v2196_v59  ;;  %v1047_v33 = vsel %vm437_vm0, %v2218_v58, 0.0  ;;  %v918_v36 = vmax.f32 %v902_v3, 0.0  ;;  %vm813_vm4 = vmor %vm811_vm14, %vm812_vm15 }
 0x234   : > { %v867_v32 = vmul.f32 %v824_v28, %v2103_v11  ;;  %v804_v31 = vsel %vm803_vm13, %v2182_v19, %v800_v6  ;;  %v807_v24 = vmul.f32 %v1760_v51, %v806_v27  ;;  %1048 = vadd.xlane.f32.xlu0 %v1047_v33  ;;  %vm852_vm2 = vweird.f32 %v1762_v30 }
 0x235   : > { %v847_v34 = vmul.f32 %v1762_v30, %v846_v22  ;;  %v865_v42 = vmul.f32 %v804_v31, %v2106_v13  ;;  %v940_v39 = vpack.c.bf16 %v918_v36, %v917_v35  ;;  %v922_v40 = vmax.f32 %v906_v29, 0.0  ;;  %vm853_vm5 = vmor %vm851_vm3, %vm852_vm2 }
 0x236   : > { %v886_v37 = vmul.f32 %v2072_v44, %v867_v32  ;;  %v808_v10 = vmul.f32 0.5, %v807_v24  ;;  %vm841_vm7 = vweird.f32 %v2215_v18  ;;  %v1808_v28 = vmov 32.0  }
 0x237   : > { %v848_v38 = vmul.f32 0.5, %v847_v34  ;;  %1676 = vmatmul.msk.bf16.gmra.mxu1 %vm511_vm1, %v940_v39  ;;  %v884_v41 = vmul.f32 %v2072_v44, %v865_v42  ;;  %1765 = vrcp.f32 %v1808_v28 }
 0x238   : > { %v1764_v11 = vpop.eup %1763  ;;  %v809_v45 = vsub.f32 1.5, %v808_v10  ;;  %v1009_v48 = vpop.f32.mrf.mxu1  ;;  %v905_v62 = vadd.f32 %v2090_v46, %v886_v37 }
 0x239   : > { %v849_v52 = vsub.f32 1.5, %v848_v38  ;;  %v836_v54 = vmul.f32 %v1764_v11, %v2215_v18  ;;  %v2246_v26 = vadd.f32 %v2191_v49, %v1009_v48  ;;  %vm842_vm6 = vweird.f32 %v1764_v11 }
 0x23a   : > { %v810_v13 = vmul.f32 %v1760_v51, %v809_v45  ;;  %v921_v19 = vmax.f32 %v905_v62, 0.0  ;;  %v903_v5 = vadd.f32 %v2090_v46, %v884_v41  ;;  %vm843_vm8 = vmor %vm841_vm7, %vm842_vm6 }
 0x23b   : > { %v850_v55 = vmul.f32 %v1762_v30, %v849_v52  ;;  %v837_v56 = vmul.f32 %v1764_v11, %v836_v54  ;;  %v1050_v20 = vsel %vm437_vm0, %v2246_v26, 0.0 }
 0x23c   : > { %v814_v57 = vsel %vm813_vm4, %v1760_v51, %v810_v13  ;;  %1051 = vadd.xlane.f32.xlu1 %v1050_v20  ;;  %v942_v23 = vpack.c.bf16 %v922_v40, %v921_v19  ;;  %v919_v15 = vmax.f32 %v903_v5, 0.0 }
 0x23d   : > { %v866_v60 = vmul.f32 %v814_v57, %v2126_v12  ;;  %v854_v61 = vsel %vm853_vm5, %v1762_v30, %v850_v55  ;;  %v838_v63 = vmul.f32 0.5, %v837_v56  ;;  %v1766_v22 = vpop.eup %1765 }
 0x23e   : > { %v870_v59 = vmul.f32 %v854_v61, %v2122_v47  ;;  %1678 = vmatmul.msk.bf16.vlgmr.msrb.gmra.mxu3 %vm511_vm1, %v942_v23  ;;  %v1093_v32 = vmul.f32 32.0, %v1766_v22  ;;  %vm1097_vm9 = vweird.f32 %v1766_v22 }
 0x23f   : > { %v839_v0 = vsub.f32 1.5, %v838_v63  ;;  %v885_v1 = vmul.f32 %v2072_v44, %v866_v60 }
 0x240   : > { %v1011_v7 = vpop.f32.mrf.mxu1  ;;  %v889_v47 = vmul.f32 %v2072_v44, %v870_v59  ;;  %v1094_v31 = vsub.f32 1.0, %v1093_v32 }
 0x241   : > { %v840_v8 = vmul.f32 %v1764_v11, %v839_v0  ;;  %v2259_v4 = vadd.f32 %v2191_v49, %v1011_v7  ;;  %v904_v12 = vadd.f32 %v2090_v46, %v885_v1 }
 0x242   : > { %v908_v51 = vadd.f32 %v2090_v46, %v889_v47  ;;  %v1095_v24 = vmul.f32 %v1766_v22, %v1094_v31  ;;  %v1705_v31 = vld [vmem:[%s2606_s9 + $0x8] sm:$0xff] }
 0x243   : > { %v844_v9 = vsel %vm843_vm8, %v1764_v11, %v840_v8  ;;  %v1053_v14 = vsel %vm437_vm0, %v2259_v4, 0.0  ;;  %v920_v53 = vmax.f32 %v904_v12, 0.0  ;;  %1515 = vmatpush.bf16.msra.mxu2 %v1705_v31  ;;  %1712 = vmatpush.bf16.msra.mxu3 %v1705_v31 }
 0x244   : > { %v869_v16 = vmul.f32 %v844_v9, %v2140_v21  ;;  %1054 = vadd.xlane.f32.xlu2 %v1053_v14  ;;  %v924_v25 = vmax.f32 %v908_v51, 0.0  ;;  %v1096_v33 = vadd.f32 %v1766_v22, %v1095_v24 }
 0x245   : > { %v941_v43 = vpack.c.bf16 %v920_v53, %v919_v15 }
 0x246   : > { %v888_v18 = vmul.f32 %v2072_v44, %v869_v16  ;;  %v2281_v34 = vsel %vm1097_vm9, %v1766_v22, %v1096_v33 }
 0x247   : > { %1677 = vmatmul.msk.bf16.gmra.mxu1 %vm511_vm1, %v941_v43 }
 0x248   : > { %v1014_v50 = vpop.f32.mrf.mxu1  ;;  %v907_v17 = vadd.f32 %v2090_v46, %v888_v18 }
 0x249   : > { %v2271_v3 = vadd.f32 %v2191_v49, %v1014_v50 }
 0x24a   : > { %v923_v30 = vmax.f32 %v907_v17, 0.0 }
 0x24b   : > { %v1056_v6 = vsel %vm437_vm0, %v2271_v3, 0.0 }
 0x24c   : > { %1057 = vadd.xlane.f32.xlu0 %v1056_v6  ;;  %v943_v21 = vpack.c.bf16 %v924_v25, %v923_v30 }
 0x24e   : > { %1679 = vmatmul.msk.bf16.gmra.mxu3 %vm511_vm1, %v943_v21 }
 0x250   : > { %v1016_v44 = vpop.f32.mrf.mxu1 }
 0x251   : > { %v2277_v27 = vadd.f32 %v2191_v49, %v1016_v44 }
 0x253   : > { %v1059_v46 = vsel %vm437_vm0, %v2277_v27, 0.0 }
 0x254   : > { %1060 = vadd.xlane.f32.xlu1 %v1059_v46 }
 0x2a1   : > { %v1046_v35 = vpop.xlane.xlu2 %1045 }
 0x2a2   : > { %v1099_v36 = vmul.f32 %v2281_v34, %v1046_v35 }
 0x2a3   : > { %v1019_v37 = vpop.f32.mrf.mxu1 }
 0x2a4   : > { %v2285_v10 = vsub.f32 %v2204_v2, %v1099_v36  ;;  %v2288_v29 = vadd.f32 %v2191_v49, %v1019_v37  ;;  %v1704_v37 = vld [vmem:[%s2606_s9] sm:$0xff] }
 0x2a5   : > { %1516 = vmatpush.bf16.msra.mxu2 %v1704_v37  ;;  %1713 = vmatpush.bf16.msra.mxu3 %v1704_v37 }
 0x2a6   : > { %v1131_v42 = vmul.f32 %v2285_v10, %v2285_v10  ;;  %v1062_v38 = vsel %vm437_vm0, %v2288_v29, 0.0 }
 0x2a7   : > { %v1049_v39 = vpop.xlane.xlu0 %1048  ;;  %1063 = vadd.xlane.f32.xlu1 %v1062_v38 }
 0x2a8   : > { %v1100_v11 = vmul.f32 %v2281_v34, %v1049_v39  ;;  %v1147_v45 = vsel %vm437_vm0, %v1131_v42, 0.0 }
 0x2a9   : > { %1148 = vadd.xlane.f32.xlu2 %v1147_v45 }
 0x2aa   : > { %v2297_v48 = vsub.f32 %v2218_v58, %v1100_v11 }
 0x2ab   : > { %v1021_v2 = vpop.f32.mrf.mxu1 }
 0x2ac   : > { %v1132_v62 = vmul.f32 %v2297_v48, %v2297_v48  ;;  %v2302_v52 = vadd.f32 %v2191_v49, %v1021_v2 }
 0x2ae   : > { %v1150_v13 = vsel %vm437_vm0, %v1132_v62, 0.0  ;;  %v1065_v19 = vsel %vm437_vm0, %v2302_v52, 0.0 }
 0x2af   : > { %v1052_v54 = vpop.xlane.xlu1 %1051  ;;  %1151 = vadd.xlane.f32.xlu0 %v1150_v13 }
 0x2b0   : > { %v1101_v40 = vmul.f32 %v2281_v34, %v1052_v54 }
 0x2b1   : > { %1066 = vadd.xlane.f32.xlu2 %v1065_v19 }
 0x2b2   : > { %v2309_v55 = vsub.f32 %v2246_v26, %v1101_v40 }
 0x2b4   : > { %v1133_v58 = vmul.f32 %v2309_v55, %v2309_v55  ;;  %v1024_v56 = vpop.f32.mrf.mxu1 }
 0x2b5   : > { %v2315_v41 = vadd.f32 %v2191_v49, %v1024_v56 }
 0x2b6   : > { %v1153_v20 = vsel %vm437_vm0, %v1133_v58, 0.0 }
 0x2b7   : > { %v1055_v57 = vpop.xlane.xlu2 %1054  ;;  %1154 = vadd.xlane.f32.xlu0 %v1153_v20  ;;  %v1068_v60 = vsel %vm437_vm0, %v2315_v41, 0.0 }
 0x2b8   : > { %v1102_v23 = vmul.f32 %v2281_v34, %v1055_v57 }
 0x2b9   : > { %1069 = vadd.xlane.f32.xlu2 %v1068_v60 }
 0x2ba   : > { %v2321_v26 = vsub.f32 %v2259_v4, %v1102_v23 }
 0x2bc   : > { %v1134_v61 = vmul.f32 %v2321_v26, %v2321_v26  ;;  %v1026_v63 = vpop.f32.mrf.mxu1 }
 0x2bd   : > { %v2327_v0 = vadd.f32 %v2191_v49, %v1026_v63 }
 0x2be   : > { %v1156_v59 = vsel %vm437_vm0, %v1134_v61, 0.0 }
 0x2bf   : > { %1157 = vadd.xlane.f32.xlu1 %v1156_v59  ;;  %v1058_v1 = vpop.xlane.xlu0 %1057  ;;  %v1071_v7 = vsel %vm437_vm0, %v2327_v0, 0.0 }
 0x2c0   : > { %v1103_v5 = vmul.f32 %v2281_v34, %v1058_v1  ;;  %1072 = vadd.xlane.f32.xlu0 %v1071_v7 }
 0x2c1   : > { %v1034_v8 = vpop.f32.mrf.mxu3 }
 0x2c2   : > { %v2333_v4 = vsub.f32 %v2271_v3, %v1103_v5  ;;  %v2356_v6 = vadd.f32 %v2191_v49, %v1034_v8 }
 0x2c4   : > { %v1135_v12 = vmul.f32 %v2333_v4, %v2333_v4  ;;  %v1029_v47 = vpop.f32.mrf.mxu1  ;;  %v1080_v21 = vsel %vm437_vm0, %v2356_v6, 0.0 }
 0x2c5   : > { %v2339_v14 = vadd.f32 %v2191_v49, %v1029_v47 }
 0x2c6   : > { %v1159_v9 = vsel %vm437_vm0, %v1135_v12, 0.0 }
 0x2c7   : > { %v1061_v15 = vpop.xlane.xlu1 %1060  ;;  %1160 = vadd.xlane.f32.xlu1 %v1159_v9  ;;  %v1074_v16 = vsel %vm437_vm0, %v2339_v14, 0.0 }
 0x2c8   : > { %v1104_v53 = vmul.f32 %v2281_v34, %v1061_v15  ;;  %1075 = vadd.xlane.f32.xlu0 %v1074_v16 }
 0x2c9   : > { %v1036_v43 = vpop.f32.mrf.mxu3 }
 0x2ca   : > { %v2345_v18 = vsub.f32 %v2277_v27, %v1104_v53  ;;  %v2381_v45 = vadd.f32 %v2191_v49, %v1036_v43 }
 0x2cc   : > { %v1136_v51 = vmul.f32 %v2345_v18, %v2345_v18  ;;  %v1031_v50 = vpop.f32.mrf.mxu1  ;;  %v1083_v19 = vsel %vm437_vm0, %v2381_v45, 0.0 }
 0x2cd   : > { %v2351_v3 = vadd.f32 %v2191_v49, %v1031_v50 }
 0x2ce   : > { %v1162_v17 = vsel %vm437_vm0, %v1136_v51, 0.0 }
 0x2cf   : > { %1163 = vadd.xlane.f32.xlu2 %v1162_v17  ;;  %v1077_v30 = vsel %vm437_vm0, %v2351_v3, 0.0 }
 0x2d0   : > { %1078 = vadd.xlane.f32.xlu1 %v1077_v30 }
 0x2d1   : > { %v1039_v25 = vpop.f32.mrf.mxu3 }
 0x2d2   : > { %v2395_v1 = vadd.f32 %v2191_v49, %v1039_v25 }
 0x2d8   : > { %1081 = vadd.xlane.f32.xlu1 %v1080_v21 }
 0x2d9   : > { %v1041_v44 = vpop.f32.mrf.mxu3 }
 0x2da   : > { %v2361_v27 = vadd.f32 %v2191_v49, %v1041_v44  ;;  %v1086_v49 = vsel %vm437_vm0, %v2395_v1, 0.0 }
 0x2dc   : > { %v1089_v46 = vsel %vm437_vm0, %v2361_v27, 0.0 }
 0x2e0   : > { %1090 = vadd.xlane.f32.xlu1 %v1089_v46 }
 0x31a   : > { %v1064_v28 = vpop.xlane.xlu1 %1063 }
 0x31b   : > { %v1105_v22 = vmul.f32 %v2281_v34, %v1064_v28 }
 0x31c   : > { %v1149_v32 = vpop.xlane.xlu2 %1148 }
 0x31d   : > { %v1195_v24 = vmul.f32 %v1149_v32, %v2281_v34  ;;  %v2371_v33 = vsub.f32 %v2288_v29, %v1105_v22  ;;  %v2421_v22 = vld [vmem:[%s2605_s8] ss:$0 sm:$0xff] }
 0x31f   : > { %v1211_v35 = vadd.f32 1e-05, %v1195_v24  ;;  %v1137_v36 = vmul.f32 %v2371_v33, %v2371_v33 }
 0x321   : > { %1767 = vrsqrt.f32 %v1211_v35  ;;  %v1165_v42 = vsel %vm437_vm0, %v1137_v36, 0.0  ;;  %vm1233_vm10 = vweird.f32 %v1211_v35 }
 0x322   : > { %v1152_v38 = vpop.xlane.xlu0 %1151  ;;  %1166 = vadd.xlane.f32.xlu2 %v1165_v42 }
 0x323   : > { %v1196_v39 = vmul.f32 %v1152_v38, %v2281_v34 }
 0x324   : > { %v1067_v29 = vpop.xlane.xlu2 %1066 }
 0x325   : > { %v1212_v11 = vadd.f32 1e-05, %v1196_v39  ;;  %v1106_v2 = vmul.f32 %v2281_v34, %v1067_v29 }
 0x327   : > { %1769 = vrsqrt.f32 %v1212_v11  ;;  %v1768_v62 = vpop.eup %1767  ;;  %v2385_v54 = vsub.f32 %v2302_v52, %v1106_v2  ;;  %vm1243_vm13 = vweird.f32 %v1212_v11 }
 0x328   : > { %v1228_v13 = vmul.f32 %v1768_v62, %v1211_v35  ;;  %vm1234_vm1 = vweird.f32 %v1768_v62 }
 0x329   : > { %v1138_v40 = vmul.f32 %v2385_v54, %v2385_v54  ;;  %vm1235_vm11 = vmor %vm1233_vm10, %vm1234_vm1 }
 0x32a   : > { %v1155_v58 = vpop.xlane.xlu0 %1154  ;;  %v1229_v56 = vmul.f32 %v1768_v62, %v1228_v13  ;;  %1084 = vadd.xlane.f32.xlu2 %v1083_v19 }
 0x32b   : > { %v1197_v20 = vmul.f32 %v1155_v58, %v2281_v34  ;;  %v1168_v57 = vsel %vm437_vm0, %v1138_v40, 0.0 }
 0x32c   : > { %v1230_v60 = vmul.f32 0.5, %v1229_v56  ;;  %v1070_v61 = vpop.xlane.xlu2 %1069  ;;  %1169 = vadd.xlane.f32.xlu0 %v1168_v57 }
 0x32d   : > { %v1770_v23 = vpop.eup %1769  ;;  %v1213_v52 = vadd.f32 1e-05, %v1197_v20  ;;  %v1107_v59 = vmul.f32 %v2281_v34, %v1070_v61 }
 0x32e   : > { %v1238_v63 = vmul.f32 %v1770_v23, %v1212_v11  ;;  %v1231_v5 = vsub.f32 1.5, %v1230_v60  ;;  %vm1244_vm12 = vweird.f32 %v1770_v23 }
 0x32f   : > { %1771 = vrsqrt.f32 %v1213_v52  ;;  %v2398_v8 = vsub.f32 %v2315_v41, %v1107_v59  ;;  %v2408_v41 = vld [vmem:[%s2604_s7] ss:$0 sm:$0xff]  ;;  %vm1245_vm14 = vmor %vm1243_vm13, %vm1244_vm12  ;;  %vm1253_vm2 = vweird.f32 %v1213_v52 }
 0x330   : > { %v1239_v7 = vmul.f32 %v1770_v23, %v1238_v63  ;;  %v1232_v12 = vmul.f32 %v1768_v62, %v1231_v5 }
 0x331   : > { %v1139_v53 = vmul.f32 %v2398_v8, %v2398_v8 }
 0x332   : > { %v1158_v47 = vpop.xlane.xlu1 %1157  ;;  %v1240_v9 = vmul.f32 0.5, %v1239_v7  ;;  %v1236_v16 = vsel %vm1235_vm11, %v1768_v62, %v1232_v12 }
 0x333   : > { %v1198_v15 = vmul.f32 %v1158_v47, %v2281_v34  ;;  %v1387_v43 = vmul.f32 %v1236_v16, %v2285_v10  ;;  %v1171_v17 = vsel %vm437_vm0, %v1139_v53, 0.0  ;;  %v1073_v30 = vpop.xlane.xlu0 %1072 }
 0x334   : > { %v1241_v51 = vsub.f32 1.5, %v1240_v9  ;;  %1172 = vadd.xlane.f32.xlu2 %v1171_v17  ;;  %1087 = vadd.xlane.f32.xlu0 %v1086_v49  ;;  %v1108_v21 = vmul.f32 %v2281_v34, %v1073_v30 }
 0x335   : > { %v1214_v50 = vadd.f32 1e-05, %v1198_v15  ;;  %v1772_v25 = vpop.eup %1771  ;;  %v1406_v10 = vmul.f32 %v2408_v41, %v1387_v43 }
 0x336   : > { %v1242_v44 = vmul.f32 %v1770_v23, %v1241_v51  ;;  %v1248_v46 = vmul.f32 %v1772_v25, %v1213_v52  ;;  %v2415_v28 = vsub.f32 %v2327_v0, %v1108_v21  ;;  %vm1254_vm15 = vweird.f32 %v1772_v25 }
 0x337   : > { %1773 = vrsqrt.f32 %v1214_v50  ;;  %v1425_v39 = vadd.f32 %v2421_v22, %v1406_v10  ;;  %vm1255_vm3 = vmor %vm1253_vm2, %vm1254_vm15  ;;  %vm1263_vm5 = vweird.f32 %v1214_v50 }
 0x338   : > { %v1246_v32 = vsel %vm1245_vm14, %v1770_v23, %v1242_v44  ;;  %v1249_v31 = vmul.f32 %v1772_v25, %v1248_v46  ;;  %v1140_v36 = vmul.f32 %v2415_v28, %v2415_v28 }
 0x339   : > { %v1388_v24 = vmul.f32 %v1246_v32, %v2297_v48  ;;  %v1441_v20 = vmax.f32 %v1425_v39, 0.0 }
 0x33a   : > { %v1161_v35 = vpop.xlane.xlu1 %1160  ;;  %v1250_v37 = vmul.f32 0.5, %v1249_v31  ;;  %v1174_v0 = vsel %vm437_vm0, %v1140_v36, 0.0 }
 0x33b   : > { %v1199_v42 = vmul.f32 %v1161_v35, %v2281_v34  ;;  %v1407_v38 = vmul.f32 %v2408_v41, %v1388_v24  ;;  %v1076_v62 = vpop.xlane.xlu0 %1075 }
 0x33c   : > { %v1251_v11 = vsub.f32 1.5, %v1250_v37  ;;  %1175 = vadd.xlane.f32.xlu0 %v1174_v0  ;;  %v1109_v48 = vmul.f32 %v2281_v34, %v1076_v62 }
 0x33d   : > { %v1774_v29 = vpop.eup %1773  ;;  %v1215_v2 = vadd.f32 1e-05, %v1199_v42  ;;  %v1426_v19 = vadd.f32 %v2421_v22, %v1407_v38 }
 0x33e   : > { %v1258_v13 = vmul.f32 %v1774_v29, %v1214_v50  ;;  %v1252_v40 = vmul.f32 %v1772_v25, %v1251_v11  ;;  %v2433_v56 = vsub.f32 %v2339_v14, %v1109_v48  ;;  %vm1264_vm4 = vweird.f32 %v1774_v29 }
 0x33f   : > { %1775 = vrsqrt.f32 %v1215_v2  ;;  %v1442_v57 = vmax.f32 %v1426_v19, 0.0  ;;  %vm1265_vm6 = vmor %vm1263_vm5, %vm1264_vm4  ;;  %vm1273_vm8 = vweird.f32 %v1215_v2 }
 0x340   : > { %v1259_v58 = vmul.f32 %v1774_v29, %v1258_v13  ;;  %v1256_v23 = vsel %vm1255_vm3, %v1772_v25, %v1252_v40  ;;  %v1141_v63 = vmul.f32 %v2433_v56, %v2433_v56 }
 0x341   : > { %v1462_v59 = vpack.c.bf16 %v1442_v57, %v1441_v20  ;;  %v1389_v5 = vmul.f32 %v1256_v23, %v2309_v55 }
 0x342   : > { %v1260_v60 = vmul.f32 0.5, %v1259_v58  ;;  %v1164_v61 = vpop.xlane.xlu2 %1163  ;;  %v1177_v12 = vsel %vm437_vm0, %v1141_v63, 0.0 }
 0x343   : > { %v1200_v7 = vmul.f32 %v1164_v61, %v2281_v34  ;;  %1688 = vmatmul.msk.bf16.vlgmr.msra.gmra.mxu2 %vm437_vm0, %v1462_v59  ;;  %v1079_v9 = vpop.xlane.xlu1 %1078  ;;  %1178 = vadd.xlane.f32.xlu1 %v1177_v12  ;;  %v1408_v55 = vmul.f32 %v2408_v41, %v1389_v5 }
 0x344   : > { %v1261_v52 = vsub.f32 1.5, %v1260_v60  ;;  %v1110_v16 = vmul.f32 %v2281_v34, %v1079_v9 }
 0x345   : > { %v1776_v14 = vpop.eup %1775  ;;  %v1216_v47 = vadd.f32 1e-05, %v1200_v7  ;;  %v1427_v21 = vadd.f32 %v2421_v22, %v1408_v55 }
 0x346   : > { %v1262_v15 = vmul.f32 %v1774_v29, %v1261_v52  ;;  %v1268_v53 = vmul.f32 %v1776_v14, %v1215_v2  ;;  %v2444_v51 = vsub.f32 %v2351_v3, %v1110_v16  ;;  %vm1274_vm7 = vweird.f32 %v1776_v14 }
 0x347   : > { %1777 = vrsqrt.f32 %v1216_v47  ;;  %vm1275_vm9 = vmor %vm1273_vm8, %vm1274_vm7  ;;  %v1443_v35 = vmax.f32 %v1427_v21, 0.0  ;;  %vm1283_vm10 = vweird.f32 %v1216_v47 }
 0x348   : > { %v1266_v49 = vsel %vm1265_vm6, %v1774_v29, %v1262_v15  ;;  %v1269_v43 = vmul.f32 %v1776_v14, %v1268_v53  ;;  %v1142_v25 = vmul.f32 %v2444_v51, %v2444_v51 }
 0x349   : > { %v1390_v17 = vmul.f32 %v1266_v49, %v2321_v26 }
 0x34a   : > { %v1270_v30 = vmul.f32 0.5, %v1269_v43  ;;  %v1180_v46 = vsel %vm437_vm0, %v1142_v25, 0.0 }
 0x34b   : > { %v1409_v50 = vmul.f32 %v2408_v41, %v1390_v17  ;;  %1181 = vadd.xlane.f32.xlu2 %v1180_v46  ;;  %v1082_v32 = vpop.xlane.xlu1 %1081 }
 0x34c   : > { %v1271_v44 = vsub.f32 1.5, %v1270_v30  ;;  %v1111_v24 = vmul.f32 %v2281_v34, %v1082_v32 }
 0x34d   : > { %v1778_v10 = vpop.eup %1777  ;;  %v1428_v3 = vadd.f32 %v2421_v22, %v1409_v50 }
 0x34e   : > { %v1272_v31 = vmul.f32 %v1776_v14, %v1271_v44  ;;  %v1278_v26 = vmul.f32 %v1778_v10, %v1216_v47  ;;  %v2455_v0 = vsub.f32 %v2356_v6, %v1111_v24  ;;  %vm1284_vm1 = vweird.f32 %v1778_v10 }
 0x34f   : > { %v1444_v36 = vmax.f32 %v1428_v3, 0.0  ;;  %vm1285_vm11 = vmor %vm1283_vm10, %vm1284_vm1  ;;  %vm1558_vm1 = vcmask 130048  }
 0x350   : > { %v1276_v37 = vsel %vm1275_vm9, %v1776_v14, %v1272_v31  ;;  %v1279_v42 = vmul.f32 %v1778_v10, %v1278_v26  ;;  %v1143_v29 = vmul.f32 %v2455_v0, %v2455_v0 }
 0x351   : > { %v1463_v38 = vpack.c.bf16 %v1444_v36, %v1443_v35  ;;  %v1391_v11 = vmul.f32 %v1276_v37, %v2333_v4 }
 0x352   : > { %v1280_v39 = vmul.f32 0.5, %v1279_v42  ;;  %v1183_v2 = vsel %vm437_vm0, %v1143_v29, 0.0 }
 0x353   : > { %1689 = vmatmul.msk.bf16.gmra.mxu2 %vm437_vm0, %v1463_v38  ;;  %v1091_v13 = vpop.xlane.xlu1 %1090  ;;  %1184 = vadd.xlane.f32.xlu0 %v1183_v2  ;;  %v1410_v19 = vmul.f32 %v2408_v41, %v1391_v11 }
 0x354   : > { %v1281_v62 = vsub.f32 1.5, %v1280_v39  ;;  %v1114_v6 = vmul.f32 %v2281_v34, %v1091_v13 }
 0x355   : > { %v1429_v23 = vadd.f32 %v2421_v22, %v1410_v19 }
 0x356   : > { %v1282_v48 = vmul.f32 %v1778_v10, %v1281_v62  ;;  %v2465_v58 = vsub.f32 %v2361_v27, %v1114_v6 }
 0x357   : > { %v1445_v63 = vmax.f32 %v1429_v23, 0.0 }
 0x358   : > { %v1286_v40 = vsel %vm1285_vm11, %v1778_v10, %v1282_v48  ;;  %v1146_v20 = vmul.f32 %v2465_v58, %v2465_v58 }
 0x359   : > { %v1392_v4 = vmul.f32 %v1286_v40, %v2345_v18 }
 0x35a   : > { %v1192_v60 = vsel %vm437_vm0, %v1146_v20, 0.0 }
 0x35b   : > { %v1411_v57 = vmul.f32 %v2408_v41, %v1392_v4  ;;  %1193 = vadd.xlane.f32.xlu0 %v1192_v60 }
 0x35d   : > { %v1430_v61 = vadd.f32 %v2421_v22, %v1411_v57 }
 0x35f   : > { %v1446_v59 = vmax.f32 %v1430_v61, 0.0 }
 0x361   : > { %v1464_v5 = vpack.c.bf16 %v1446_v59, %v1445_v63 }
 0x363   : > { %1690 = vmatmul.msk.bf16.gmra.mxu2 %vm437_vm0, %v1464_v5 }
 0x395   : > { %v1167_v27 = vpop.xlane.xlu2 %1166 }
 0x396   : > { %v1201_v18 = vmul.f32 %v1167_v27, %v2281_v34 }
 0x398   : > { %v1217_v7 = vadd.f32 1e-05, %v1201_v18 }
 0x39a   : > { %1779 = vrsqrt.f32 %v1217_v7  ;;  %vm1293_vm13 = vweird.f32 %v1217_v7 }
 0x39d   : > { %v1085_v52 = vpop.xlane.xlu2 %1084 }
 0x39e   : > { %v1112_v12 = vmul.f32 %v2281_v34, %v1085_v52 }
 0x39f   : > { %v1170_v14 = vpop.xlane.xlu0 %1169 }
 0x3a0   : > { %v1780_v47 = vpop.eup %1779  ;;  %v2478_v9 = vsub.f32 %v2381_v45, %v1112_v12  ;;  %v1202_v15 = vmul.f32 %v1170_v14, %v2281_v34 }
 0x3a1   : > { %v1288_v53 = vmul.f32 %v1780_v47, %v1217_v7  ;;  %vm1294_vm12 = vweird.f32 %v1780_v47 }
 0x3a2   : > { %v1218_v16 = vadd.f32 1e-05, %v1202_v15  ;;  %v1144_v55 = vmul.f32 %v2478_v9, %v2478_v9  ;;  %vm1295_vm14 = vmor %vm1293_vm13, %vm1294_vm12 }
 0x3a3   : > { %v1289_v49 = vmul.f32 %v1780_v47, %v1288_v53 }
 0x3a4   : > { %1781 = vrsqrt.f32 %v1218_v16  ;;  %v1186_v43 = vsel %vm437_vm0, %v1144_v55, 0.0  ;;  %vm1303_vm2 = vweird.f32 %v1218_v16 }
 0x3a5   : > { %v1290_v17 = vmul.f32 0.5, %v1289_v49  ;;  %1187 = vadd.xlane.f32.xlu1 %v1186_v43  ;;  %v2506_v49 = vld [vmem:[%s2607_s10] ss:$0 sm:$0xff] }
 0x3a7   : > { %v1291_v30 = vsub.f32 1.5, %v1290_v17  ;;  %v1173_v25 = vpop.xlane.xlu2 %1172  ;;  %v1088_v50 = vpop.xlane.xlu0 %1087 }
 0x3a8   : > { %v1203_v21 = vmul.f32 %v1173_v25, %v2281_v34  ;;  %v1113_v45 = vmul.f32 %v2281_v34, %v1088_v50 }
 0x3a9   : > { %v1292_v44 = vmul.f32 %v1780_v47, %v1291_v30 }
 0x3aa   : > { %v1782_v46 = vpop.eup %1781  ;;  %v1219_v10 = vadd.f32 1e-05, %v1203_v21  ;;  %v2487_v32 = vsub.f32 %v2395_v1, %v1113_v45 }
 0x3ab   : > { %v1298_v3 = vmul.f32 %v1782_v46, %v1218_v16  ;;  %v1296_v26 = vsel %vm1295_vm14, %v1780_v47, %v1292_v44  ;;  %vm1304_vm15 = vweird.f32 %v1782_v46 }
 0x3ac   : > { %1783 = vrsqrt.f32 %v1219_v10  ;;  %v1145_v31 = vmul.f32 %v2487_v32, %v2487_v32  ;;  %v1393_v42 = vmul.f32 %v1296_v26, %v2371_v33  ;;  %vm1305_vm3 = vmor %vm1303_vm2, %vm1304_vm15  ;;  %vm1313_vm5 = vweird.f32 %v1219_v10 }
 0x3ad   : > { %v1299_v24 = vmul.f32 %v1782_v46, %v1298_v3 }
 0x3ae   : > { %v1189_v35 = vsel %vm437_vm0, %v1145_v31, 0.0  ;;  %v1412_v2 = vmul.f32 %v2408_v41, %v1393_v42 }
 0x3af   : > { %v1300_v36 = vmul.f32 0.5, %v1299_v24  ;;  %1190 = vadd.xlane.f32.xlu2 %v1189_v35  ;;  %v1176_v37 = vpop.xlane.xlu0 %1175 }
 0x3b0   : > { %v1204_v38 = vmul.f32 %v1176_v37, %v2281_v34  ;;  %v1431_v20 = vadd.f32 %v2421_v22, %v1412_v2 }
 0x3b1   : > { %v1301_v1 = vsub.f32 1.5, %v1300_v36 }
 0x3b2   : > { %v1784_v39 = vpop.eup %1783  ;;  %v1220_v29 = vadd.f32 1e-05, %v1204_v38 }
 0x3b3   : > { %v1302_v11 = vmul.f32 %v1782_v46, %v1301_v1  ;;  %v1308_v62 = vmul.f32 %v1784_v39, %v1219_v10  ;;  %vm1314_vm4 = vweird.f32 %v1784_v39 }
 0x3b4   : > { %1785 = vrsqrt.f32 %v1220_v29  ;;  %vm1315_vm6 = vmor %vm1313_vm5, %vm1314_vm4  ;;  %vm1323_vm8 = vweird.f32 %v1220_v29 }
 0x3b5   : > { %v1306_v13 = vsel %vm1305_vm3, %v1782_v46, %v1302_v11  ;;  %v1309_v48 = vmul.f32 %v1784_v39, %v1308_v62 }
 0x3b6   : > { %v1394_v6 = vmul.f32 %v1306_v13, %v2385_v54  ;;  %v1179_v19 = vpop.xlane.xlu1 %1178  ;;  %v1447_v54 = vmax.f32 %v1431_v20, 0.0 }
 0x3b7   : > { %v1310_v40 = vmul.f32 0.5, %v1309_v48  ;;  %v1205_v33 = vmul.f32 %v1179_v19, %v2281_v34 }
 0x3b8   : > { %v1413_v4 = vmul.f32 %v2408_v41, %v1394_v6 }
 0x3b9   : > { %v1311_v57 = vsub.f32 1.5, %v1310_v40  ;;  %v1221_v23 = vadd.f32 1e-05, %v1205_v33 }
 0x3ba   : > { %v1786_v60 = vpop.eup %1785  ;;  %v1432_v61 = vadd.f32 %v2421_v22, %v1413_v4 }
 0x3bb   : > { %v1312_v63 = vmul.f32 %v1784_v39, %v1311_v57  ;;  %v1318_v59 = vmul.f32 %v1786_v60, %v1220_v29  ;;  %1787 = vrsqrt.f32 %v1221_v23  ;;  %vm1324_vm7 = vweird.f32 %v1786_v60 }
 0x3bc   : > { %v1448_v5 = vmax.f32 %v1432_v61, 0.0  ;;  %vm1325_vm9 = vmor %vm1323_vm8, %vm1324_vm7  ;;  %vm1333_vm11 = vweird.f32 %v1221_v23 }
 0x3bd   : > { %v1316_v27 = vsel %vm1315_vm6, %v1784_v39, %v1312_v63  ;;  %v1319_v18 = vmul.f32 %v1786_v60, %v1318_v59 }
 0x3be   : > { %v1182_v7 = vpop.xlane.xlu2 %1181  ;;  %v1465_v52 = vpack.c.bf16 %v1448_v5, %v1447_v54  ;;  %v1395_v47 = vmul.f32 %v1316_v27, %v2398_v8 }
 0x3bf   : > { %v1320_v12 = vmul.f32 0.5, %v1319_v18  ;;  %v1206_v14 = vmul.f32 %v1182_v7, %v2281_v34 }
 0x3c0   : > { %1691 = vmatmul.msk.bf16.gmra.mxu2 %vm437_vm0, %v1465_v52  ;;  %v1414_v30 = vmul.f32 %v2408_v41, %v1395_v47 }
 0x3c1   : > { %v1788_v15 = vpop.eup %1787  ;;  %v1321_v53 = vsub.f32 1.5, %v1320_v12  ;;  %v1222_v16 = vadd.f32 1e-05, %v1206_v14 }
 0x3c2   : > { %v1328_v55 = vmul.f32 %v1788_v15, %v1221_v23  ;;  %vm1334_vm10 = vweird.f32 %v1788_v15  ;;  %v1433_v10 = vadd.f32 %v2421_v22, %v1414_v30 }
 0x3c3   : > { %v1322_v43 = vmul.f32 %v1786_v60, %v1321_v53  ;;  %1789 = vrsqrt.f32 %v1222_v16  ;;  %vm1335_vm12 = vmor %vm1333_vm11, %vm1334_vm10  ;;  %vm1343_vm14 = vweird.f32 %v1222_v16 }
 0x3c4   : > { %v1329_v17 = vmul.f32 %v1788_v15, %v1328_v55  ;;  %v1449_v36 = vmax.f32 %v1433_v10, 0.0 }
 0x3c5   : > { %v1326_v8 = vsel %vm1325_vm9, %v1786_v60, %v1322_v43 }
 0x3c6   : > { %v1518_v25 = vpop.f32.mrf.mxu2  ;;  %v1396_v50 = vmul.f32 %v1326_v8, %v2415_v28  ;;  %v1330_v21 = vmul.f32 0.5, %v1329_v17  ;;  %v1185_v54 = vpop.xlane.xlu0 %1184 }
 0x3c7   : > { %v1519_v45 = vadd.f32 %v2506_v49, %v1518_v25  ;;  %v1207_v5 = vmul.f32 %v1185_v54, %v2281_v34 }
 0x3c8   : > { %v1331_v44 = vsub.f32 1.5, %v1330_v21  ;;  %v1415_v46 = vmul.f32 %v2408_v41, %v1396_v50 }
 0x3c9   : > { %1559 = vst.msk [vmem:[%s2514_s23] sm:$0xff] %vm1558_vm1, %v1519_v45  ;;  %v1790_v3 = vpop.eup %1789  ;;  %v1223_v27 = vadd.f32 1e-05, %v1207_v5 }
 0x3ca   : > { %v1332_v31 = vmul.f32 %v1788_v15, %v1331_v44  ;;  %v1338_v26 = vmul.f32 %v1790_v3, %v1222_v16  ;;  %v1434_v24 = vadd.f32 %v2421_v22, %v1415_v46  ;;  %vm1344_vm13 = vweird.f32 %v1790_v3 }
 0x3cb   : > { %vm1345_vm15 = vmor %vm1343_vm14, %vm1344_vm13  ;;  %1791 = vrsqrt.f32 %v1223_v27  ;;  %vm1353_vm3 = vweird.f32 %v1223_v27 }
 0x3cc   : > { %v1336_v28 = vsel %vm1335_vm12, %v1788_v15, %v1332_v31  ;;  %v1339_v35 = vmul.f32 %v1790_v3, %v1338_v26  ;;  %v1450_v37 = vmax.f32 %v1434_v24, 0.0 }
 0x3cd   : > { %v1397_v29 = vmul.f32 %v1336_v28, %v2433_v56 }
 0x3ce   : > { %v1520_v42 = vpop.f32.mrf.mxu2  ;;  %v1340_v38 = vmul.f32 0.5, %v1339_v35  ;;  %v1466_v39 = vpack.c.bf16 %v1450_v37, %v1449_v36  ;;  %v1194_v18 = vpop.xlane.xlu0 %1193 }
 0x3cf   : > { %v1521_v1 = vadd.f32 %v2506_v49, %v1520_v42  ;;  %v1416_v2 = vmul.f32 %v2408_v41, %v1397_v29  ;;  %v1210_v7 = vmul.f32 %v1194_v18, %v2281_v34 }
 0x3d0   : > { %v1341_v11 = vsub.f32 1.5, %v1340_v38  ;;  %1692 = vmatmul.msk.bf16.gmra.mxu2 %vm437_vm0, %v1466_v39 }
 0x3d1   : > { %1560 = vst.msk [vmem:[%s2514_s23 + $0x8] sm:$0xff] %vm1558_vm1, %v1521_v1  ;;  %v1435_v40 = vadd.f32 %v2421_v22, %v1416_v2  ;;  %v1792_v52 = vpop.eup %1791  ;;  %v1226_v12 = vadd.f32 1e-05, %v1210_v7 }
 0x3d2   : > { %v1342_v62 = vmul.f32 %v1790_v3, %v1341_v11  ;;  %v1348_v14 = vmul.f32 %v1792_v52, %v1223_v27  ;;  %vm1354_vm2 = vweird.f32 %v1792_v52 }
 0x3d3   : > { %v1451_v4 = vmax.f32 %v1435_v40, 0.0  ;;  %1793 = vrsqrt.f32 %v1226_v12  ;;  %vm1355_vm4 = vmor %vm1353_vm3, %vm1354_vm2  ;;  %vm1383_vm9 = vweird.f32 %v1226_v12 }
 0x3d4   : > { %v1346_v13 = vsel %vm1345_vm15, %v1790_v3, %v1342_v62  ;;  %v1349_v47 = vmul.f32 %v1792_v52, %v1348_v14 }
 0x3d5   : > { %v1398_v48 = vmul.f32 %v1346_v13, %v2444_v51 }
 0x3d6   : > { %v1523_v6 = vpop.f32.mrf.mxu2  ;;  %v1350_v55 = vmul.f32 0.5, %v1349_v47 }
 0x3d7   : > { %v1524_v19 = vadd.f32 %v2506_v49, %v1523_v6  ;;  %v1417_v56 = vmul.f32 %v2408_v41, %v1398_v48 }
 0x3d8   : > { %v1351_v30 = vsub.f32 1.5, %v1350_v55 }
 0x3d9   : > { %1561 = vst.msk [vmem:[%s2514_s23 + $0x10] sm:$0xff] %vm1558_vm1, %v1524_v19  ;;  %v1436_v33 = vadd.f32 %v2421_v22, %v1417_v56  ;;  %v1794_v53 = vpop.eup %1793 }
 0x3da   : > { %v1378_v17 = vmul.f32 %v1794_v53, %v1226_v12  ;;  %v1352_v25 = vmul.f32 %v1792_v52, %v1351_v30  ;;  %vm1384_vm6 = vweird.f32 %v1794_v53 }
 0x3db   : > { %v1452_v20 = vmax.f32 %v1436_v33, 0.0  ;;  %vm1385_vm10 = vmor %vm1383_vm9, %vm1384_vm6 }
 0x3dc   : > { %v1379_v8 = vmul.f32 %v1794_v53, %v1378_v17  ;;  %v1356_v3 = vsel %vm1355_vm4, %v1792_v52, %v1352_v25 }
 0x3dd   : > { %v1467_v23 = vpack.c.bf16 %v1452_v20, %v1451_v4  ;;  %v1399_v28 = vmul.f32 %v1356_v3, %v2455_v0 }
 0x3de   : > { %v1525_v57 = vpop.f32.mrf.mxu2  ;;  %v1380_v44 = vmul.f32 0.5, %v1379_v8 }
 0x3df   : > { %v1526_v60 = vadd.f32 %v2506_v49, %v1525_v57 }
 0x3e0   : > { %1693 = vmatmul.msk.bf16.gmra.mxu2 %vm437_vm0, %v1467_v23  ;;  %v1381_v26 = vsub.f32 1.5, %v1380_v44 }
 0x3e1   : > { %1562 = vst.msk [vmem:[%s2514_s23 + $0x18] sm:$0xff] %vm1558_vm1, %v1526_v60 }
 0x3e2   : > { %v1382_v36 = vmul.f32 %v1794_v53, %v1381_v26 }
 0x3e4   : > { %v1386_v29 = vsel %vm1385_vm10, %v1794_v53, %v1382_v36 }
 0x3e5   : > { %v1402_v13 = vmul.f32 %v1386_v29, %v2465_v58 }
 0x3e6   : > { %v1528_v51 = vpop.f32.mrf.mxu2 }
 0x3e7   : > { %v1529_v61 = vadd.f32 %v2506_v49, %v1528_v51 }
 0x3e9   : > { %1563 = vst.msk [vmem:[%s2514_s23 + $0x20] sm:$0xff] %vm1558_vm1, %v1529_v61 }
 0x3ee   : > { %v1530_v63 = vpop.f32.mrf.mxu2 }
 0x3ef   : > { %v1531_v59 = vadd.f32 %v2506_v49, %v1530_v63 }
 0x3f1   : > { %1564 = vst.msk [vmem:[%s2514_s23 + $0x28] sm:$0xff] %vm1558_vm1, %v1531_v59 }
 0x418   : > { %v1188_v15 = vpop.xlane.xlu1 %1187 }
 0x419   : > { %v1208_v16 = vmul.f32 %v1188_v15, %v2281_v34 }
 0x41b   : > { %v1224_v43 = vadd.f32 1e-05, %v1208_v16 }
 0x41d   : > { %1795 = vrsqrt.f32 %v1224_v43  ;;  %vm1363_vm7 = vweird.f32 %v1224_v43 }
 0x422   : > { %v1191_v50 = vpop.xlane.xlu2 %1190 }
 0x423   : > { %v1796_v21 = vpop.eup %1795  ;;  %v1209_v45 = vmul.f32 %v1191_v50, %v2281_v34  ;;  %v1418_v34 = vmul.f32 %v2408_v41, %v1399_v28 }
 0x424   : > { %v1358_v46 = vmul.f32 %v1796_v21, %v1224_v43  ;;  %vm1364_vm5 = vweird.f32 %v1796_v21 }
 0x425   : > { %v1225_v10 = vadd.f32 1e-05, %v1209_v45  ;;  %vm1365_vm8 = vmor %vm1363_vm7, %vm1364_vm5  ;;  %v1437_v62 = vadd.f32 %v2421_v22, %v1418_v34 }
 0x426   : > { %v1359_v31 = vmul.f32 %v1796_v21, %v1358_v46 }
 0x427   : > { %1797 = vrsqrt.f32 %v1225_v10  ;;  %v1453_v19 = vmax.f32 %v1437_v62, 0.0  ;;  %vm1373_vm12 = vweird.f32 %v1225_v10 }
 0x428   : > { %v1360_v24 = vmul.f32 0.5, %v1359_v31 }
 0x42a   : > { %v1361_v35 = vsub.f32 1.5, %v1360_v24 }
 0x42c   : > { %v1362_v37 = vmul.f32 %v1796_v21, %v1361_v35 }
 0x42d   : > { %v1798_v42 = vpop.eup %1797 }
 0x42e   : > { %v1366_v38 = vsel %vm1365_vm8, %v1796_v21, %v1362_v37  ;;  %v1368_v1 = vmul.f32 %v1798_v42, %v1225_v10  ;;  %vm1374_vm11 = vweird.f32 %v1798_v42 }
 0x42f   : > { %v1400_v39 = vmul.f32 %v1366_v38, %v2478_v9  ;;  %v1421_v9 = vmul.f32 %v2408_v41, %v1402_v13  ;;  %vm1375_vm13 = vmor %vm1373_vm12, %vm1374_vm11 }
 0x430   : > { %v1369_v11 = vmul.f32 %v1798_v42, %v1368_v1 }
 0x431   : > { %v1419_v0 = vmul.f32 %v2408_v41, %v1400_v39  ;;  %v1440_v58 = vadd.f32 %v2421_v22, %v1421_v9 }
 0x432   : > { %v1370_v2 = vmul.f32 0.5, %v1369_v11 }
 0x433   : > { %v1438_v48 = vadd.f32 %v2421_v22, %v1419_v0  ;;  %v1456_v51 = vmax.f32 %v1440_v58, 0.0 }
 0x434   : > { %v1371_v6 = vsub.f32 1.5, %v1370_v2 }
 0x435   : > { %v1454_v56 = vmax.f32 %v1438_v48, 0.0 }
 0x436   : > { %v1372_v40 = vmul.f32 %v1798_v42, %v1371_v6 }
 0x437   : > { %v1468_v33 = vpack.c.bf16 %v1454_v56, %v1453_v19 }
 0x438   : > { %v1376_v4 = vsel %vm1375_vm13, %v1798_v42, %v1372_v40 }
 0x439   : > { %v1401_v20 = vmul.f32 %v1376_v4, %v2487_v32  ;;  %1694 = vmatmul.msk.bf16.gmra.mxu2 %vm437_vm0, %v1468_v33 }
 0x43b   : > { %v1420_v57 = vmul.f32 %v2408_v41, %v1401_v20 }
 0x43d   : > { %v1439_v23 = vadd.f32 %v2421_v22, %v1420_v57 }
 0x43f   : > { %v1455_v60 = vmax.f32 %v1439_v23, 0.0 }
 0x441   : > { %v1469_v61 = vpack.c.bf16 %v1456_v51, %v1455_v60 }
 0x443   : > { %v1533_v63 = vpop.f32.mrf.mxu2  ;;  %1695 = vmatmul.msk.bf16.vlgmr.msra.gmra.mxu3 %vm437_vm0, %v1469_v61 }
 0x444   : > { %v1534_v59 = vadd.f32 %v2506_v49, %v1533_v63 }
 0x446   : > { %1565 = vst.msk [vmem:[%s2514_s23 + $0x30] sm:$0xff] %vm1558_vm1, %v1534_v59 }
 0x44b   : > { %v1535_v32 = vpop.f32.mrf.mxu2 }
 0x44c   : > { %v1536_v54 = vadd.f32 %v2506_v49, %v1535_v32 }
 0x44e   : > { %1566 = vst.msk [vmem:[%s2514_s23 + $0x38] sm:$0xff] %vm1558_vm1, %v1536_v54 }
 0x453   : > { %v1538_v41 = vpop.f32.mrf.mxu2 }
 0x454   : > { %v1539_v22 = vadd.f32 %v2506_v49, %v1538_v41 }
 0x456   : > { %1567 = vst.msk [vmem:[%s2514_s23 + $0x40] sm:$0xff] %vm1558_vm1, %v1539_v22 }
 0x45b   : > { %v1540_v5 = vpop.f32.mrf.mxu2 }
 0x45c   : > { %v1541_v27 = vadd.f32 %v2506_v49, %v1540_v5 }
 0x45e   : > { %1568 = vst.msk [vmem:[%s2514_s23 + $0x48] sm:$0xff] %vm1558_vm1, %v1541_v27 }
 0x463   : > { %v1543_v18 = vpop.f32.mrf.mxu2 }
 0x464   : > { %v1544_v7 = vadd.f32 %v2506_v49, %v1543_v18 }
 0x466   : > { %1569 = vst.msk [vmem:[%s2514_s23 + $0x50] sm:$0xff] %vm1558_vm1, %v1544_v7 }
 0x46b   : > { %v1545_v52 = vpop.f32.mrf.mxu2 }
 0x46c   : > { %v1546_v12 = vadd.f32 %v2506_v49, %v1545_v52 }
 0x46e   : > { %1570 = vst.msk [vmem:[%s2514_s23 + $0x58] sm:$0xff] %vm1558_vm1, %v1546_v12 }
 0x4bc   : > { %v1548_v14 = vpop.f32.mrf.mxu2 }
 0x4bd   : > { %v1549_v47 = vadd.f32 %v2506_v49, %v1548_v14 }
 0x4bf   : > { %1571 = vst.msk [vmem:[%s2514_s23 + $0x60] sm:$0xff] %vm1558_vm1, %v1549_v47 }
 0x4c4   : > { %v1550_v15 = vpop.f32.mrf.mxu2 }
 0x4c5   : > { %v1551_v53 = vadd.f32 %v2506_v49, %v1550_v15 }
 0x4c6   : > { %v1553_v16 = vpop.f32.mrf.mxu3 }
 0x4c7   : > { %1572 = vst.msk [vmem:[%s2514_s23 + $0x68] sm:$0xff] %vm1558_vm1, %v1551_v53  ;;  %v1554_v55 = vadd.f32 %v2506_v49, %v1553_v16 }
 0x4c9   : > { %1573 = vst.msk [vmem:[%s2514_s23 + $0x70] sm:$0xff] %vm1558_vm1, %v1554_v55 }
 0x4ce   : > { %v1555_v43 = vpop.f32.mrf.mxu3 }
 0x4cf   : > { %v1556_v17 = vadd.f32 %v2506_v49, %v1555_v43 }
 0x4d1   : > { %1574 = vst.msk [vmem:[%s2514_s23 + $0x78] sm:$0xff] %vm1558_vm1, %v1556_v17 }
 0x4d2 PF: > { %s21_s17 = sadd.s32 1, %s1805_s17  }
 0x4d3   : > { %p18_p4 = scmp.ge.s32.totalorder %s21_s17, 4  }
 0x4d5   :  { %20 = sbr.rel (!%p18_p4) target bundleno = 1 (0x1), region = 94 }

</bundles_post_ra>
